<compile_context>
chip_gen: v5e
topology: v5e:2x2
jax: 0.10.0
libtpu: 0.0.40
codegen_flags: <defaults>
</compile_context>

<pallas_src>
import functools

import jax
import jax.numpy as jnp
from jax.experimental import pallas as pl
from jax.experimental.pallas import tpu as pltpu


# Conservative VMEM cap: safe on v7x (64 MiB physical per TC) and leaves large headroom on
# v5e/v6e (128 MiB). The actual working set here is only a few MiB.
_VMEM_LIMIT_BYTES = 48 * 1024 * 1024


def _round_up(x, m):
    return (x + m - 1) // m * m


# ---------------------------------------------------------------------------
# Kernel A: LayerNorm + layer-0 input projection   gx = LN(x) @ W_ih0 + b0
# (b0 already contains b_ih0 + [b_hh0_r, b_hh0_z, 0]).
# Row-tiled over M rows; weights/biases resident across the (parallel) grid.
# ---------------------------------------------------------------------------
def _proj_kernel(x_ref, g_ref, b_ln_ref, w_ref, b_ref, o_ref, *, eps):
    xf = x_ref[...].astype(jnp.float32)
    mean = jnp.mean(xf, axis=-1, keepdims=True)
    var = jnp.mean(jnp.square(xf - mean), axis=-1, keepdims=True)
    xn = (xf - mean) * jax.lax.rsqrt(var + eps)
    xn = xn * g_ref[...].astype(jnp.float32) + b_ln_ref[...].astype(jnp.float32)
    x = xn.astype(w_ref.dtype)                       # MXU operands in weight (compute) dtype
    y = jnp.dot(x, w_ref[...], preferred_element_type=jnp.float32)
    y = y + b_ref[...].astype(jnp.float32)
    o_ref[...] = y.astype(o_ref.dtype)


def _input_projection(x2, gamma, beta, w, b, *, eps=1e-5, tm=512):
    """x2: [M, D] -> [M, 3H] f32; y = LN(x2) @ w + b."""
    M, D = x2.shape
    N = w.shape[1]
    tm = min(tm, _round_up(M, 8))
    Mp = _round_up(M, tm)
    if Mp != M:
        x2 = jnp.pad(x2, ((0, Mp - M), (0, 0)))
    grid = (Mp // tm,)
    out = pl.pallas_call(
        functools.partial(_proj_kernel, eps=eps),
        out_shape=jax.ShapeDtypeStruct((Mp, N), jnp.float32),
        grid_spec=pltpu.PrefetchScalarGridSpec(
            num_scalar_prefetch=0,
            grid=grid,
            in_specs=[
                pl.BlockSpec((tm, D), lambda i: (i, 0)),   # x row tile
                pl.BlockSpec((1, D), lambda i: (0, 0)),    # ln gamma (resident)
                pl.BlockSpec((1, D), lambda i: (0, 0)),    # ln beta
                pl.BlockSpec((D, N), lambda i: (0, 0)),    # W_ih0 (resident)
                pl.BlockSpec((1, N), lambda i: (0, 0)),    # combined bias
            ],
            out_specs=pl.BlockSpec((tm, N), lambda i: (i, 0)),
        ),
        compiler_params=pltpu.CompilerParams(
            dimension_semantics=("parallel",),
            vmem_limit_bytes=_VMEM_LIMIT_BYTES,
        ),
    )(x2, gamma, beta, w, b)
    return out[:M]


# ---------------------------------------------------------------------------
# Kernel B: fused multi-layer GRU recurrence, time-chunked.
#   grid=(T_pad // TC,) is sequential ("arbitrary"); each grid step runs an
#   in-kernel fori_loop over TC timesteps with the hidden states carried in
#   vregs and persisted in a VMEM scratch across chunks.
# ---------------------------------------------------------------------------
def _fused_gru_kernel(gx_ref, wih_r_ref, bih_r_ref, whh_ref, bhhn_ref, o_ref, h_ref,
                      *, hidden, tc, num_layers, compute_dtype):
    c = pl.program_id(0)

    @pl.when(c == 0)
    def _():
        h_ref[...] = jnp.zeros_like(h_ref)           # h0 = 0 (PyTorch default)

    H = hidden

    def cell(gates_x, h_prev, w_hh, b_hh_n):
        # gates_x already contains b_ih (+ folded b_hr, b_hz). b_hh_n must stay inside
        # r * (.) per PyTorch GRU semantics.
        hh = jnp.dot(h_prev.astype(compute_dtype), w_hh,
                     preferred_element_type=jnp.float32)
        r = jax.nn.sigmoid(gates_x[:, :H] + hh[:, :H])
        z = jax.nn.sigmoid(gates_x[:, H:2 * H] + hh[:, H:2 * H])
        n = jnp.tanh(gates_x[:, 2 * H:] + r * (hh[:, 2 * H:] + b_hh_n))
        return (1.0 - z) * n + z * h_prev

    def step(t, hs):
        gx = gx_ref[t].astype(jnp.float32)           # (Bp, 3H) precomputed layer-0 gates
        new_hs = []
        prev = None
        for l in range(num_layers):
            if l == 0:
                gates = gx
            else:
                # Layer-l input projection fused into the same timestep (free MXU filler).
                gates = (jnp.dot(prev.astype(compute_dtype), wih_r_ref[l - 1],
                                 preferred_element_type=jnp.float32)
                         + bih_r_ref[l - 1])
            h_new = cell(gates, hs[l], whh_ref[l], bhhn_ref[l])
            new_hs.append(h_new)
            prev = h_new
        o_ref[t] = prev.astype(o_ref.dtype)          # emit top-layer hidden state
        return tuple(new_hs)

    hs0 = tuple(h_ref[l] for l in range(num_layers))
    hs_final = jax.lax.fori_loop(0, tc, step, hs0, unroll=2)
    for l in range(num_layers):
        h_ref[l] = hs_final[l]                       # persist carry across chunks


def _fused_recurrence(gx, w_ih_rest, b_ih_rest, w_hh_all, b_hh_n_all, *,
                      hidden, num_layers, tc, out_dtype, compute_dtype):
    """gx: [T_pad, Bp, 3H] f32 -> top-layer hidden sequence [T_pad, Bp, H]."""
    T_pad, Bp, threeH = gx.shape
    Lm1 = w_ih_rest.shape[0]
    grid = (T_pad // tc,)
    return pl.pallas_call(
        functools.partial(_fused_gru_kernel, hidden=hidden, tc=tc,
                          num_layers=num_layers, compute_dtype=compute_dtype),
        out_shape=jax.ShapeDtypeStruct((T_pad, Bp, hidden), out_dtype),
        grid_spec=pltpu.PrefetchScalarGridSpec(
            num_scalar_prefetch=0,
            grid=grid,
            in_specs=[
                pl.BlockSpec((tc, Bp, threeH), lambda c: (c, 0, 0)),           # gx chunk
                pl.BlockSpec((Lm1, hidden, threeH), lambda c: (0, 0, 0)),      # W_ih l>=1 (resident)
                pl.BlockSpec((Lm1, 1, threeH), lambda c: (0, 0, 0)),           # combined b_ih l>=1
                pl.BlockSpec((num_layers, hidden, threeH), lambda c: (0, 0, 0)),  # W_hh all layers
                pl.BlockSpec((num_layers, 1, hidden), lambda c: (0, 0, 0)),    # b_hh n-gate slices
            ],
            out_specs=pl.BlockSpec((tc, Bp, hidden), lambda c: (c, 0, 0)),
            scratch_shapes=[pltpu.VMEM((num_layers, Bp, hidden), jnp.float32)],  # carried h states
        ),
        compiler_params=pltpu.CompilerParams(
            dimension_semantics=("arbitrary",),
            vmem_limit_bytes=_VMEM_LIMIT_BYTES,
        ),
    )(gx, w_ih_rest, b_ih_rest, w_hh_all, b_hh_n_all)


# ---------------------------------------------------------------------------
# Full forward: x[B, C, T] -> LayerNorm -> L-layer GRU -> [B, C, T]
# ---------------------------------------------------------------------------
def gru_layer_forward(x, params, *, eps=1e-5, compute_dtype=jnp.bfloat16, tc=64, tm=512):
    B, C, T = x.shape
    D = C
    H = D
    L = params["num_layers"]
    Bp = _round_up(B, 8)                                   # sublane-pad the batch

    xt = jnp.transpose(x, (2, 0, 1))                       # b c t -> t b c
    if Bp != B:
        xt = jnp.pad(xt, ((0, 0), (0, Bp - B), (0, 0)))
    rows = xt.reshape(T * Bp, D)                           # time-major rows

    gamma = params["ln_gamma"].reshape(1, D)
    beta = params["ln_beta"].reshape(1, D)

    zero = jnp.zeros((H,), jnp.float32)

    def combined_bias(layer):
        # b_ih + [b_hh_r, b_hh_z, 0]  (the n-gate recurrent bias stays in the kernel)
        b_ih = params[f"b_ih_l{layer}"].astype(jnp.float32)
        b_hh = params[f"b_hh_l{layer}"].astype(jnp.float32)
        return b_ih + jnp.concatenate([b_hh[:H], b_hh[H:2 * H], zero])

    # Layer-0 input projection (+ LayerNorm), over all rows in parallel.
    w_ih0 = params["w_ih_l0"].astype(compute_dtype)
    b0 = combined_bias(0).reshape(1, 3 * H)
    gx = _input_projection(rows, gamma, beta, w_ih0, b0, eps=eps, tm=tm)   # [T*Bp, 3H] f32

    # Stacked recurrent weights (resident in the fused recurrence kernel).
    w_hh_all = jnp.stack([params[f"w_hh_l{l}"] for l in range(L)]).astype(compute_dtype)
    b_hh_n_all = jnp.stack(
        [params[f"b_hh_l{l}"][2 * H:] for l in range(L)]
    ).astype(jnp.float32).reshape(L, 1, H)
    if L > 1:
        w_ih_rest = jnp.stack(
            [params[f"w_ih_l{l}"] for l in range(1, L)]).astype(compute_dtype)
        b_ih_rest = jnp.stack(
            [combined_bias(l) for l in range(1, L)]).reshape(L - 1, 1, 3 * H)
    else:
        w_ih_rest = jnp.zeros((1, H, 3 * H), compute_dtype)    # unused placeholder
        b_ih_rest = jnp.zeros((1, 1, 3 * H), jnp.float32)

    # Time-chunked fused recurrence over all layers.
    TC = min(tc, T)
    T_pad = _round_up(T, TC)
    gx = gx.reshape(T, Bp, 3 * H)
    if T_pad != T:
        gx = jnp.pad(gx, ((0, T_pad - T), (0, 0), (0, 0)))

    h_seq = _fused_recurrence(gx, w_ih_rest, b_ih_rest, w_hh_all, b_hh_n_all,
                              hidden=H, num_layers=L, tc=TC,
                              out_dtype=x.dtype, compute_dtype=compute_dtype)

    out = h_seq[:T, :B, :]                                  # drop time/batch padding
    return jnp.transpose(out, (1, 2, 0))                    # t b h -> b h t


# ---------------------------------------------------------------------------
# Params + pure-JAX reference
# ---------------------------------------------------------------------------
def init_params(key, dim, num_layers, dtype=jnp.float32):
    params = {
        "num_layers": num_layers,
        "ln_gamma": jnp.ones((dim,), dtype),
        "ln_beta": jnp.zeros((dim,), dtype),
    }
    lim = 1.0 / (dim ** 0.5)                                # torch.nn.GRU default init
    keys = jax.random.split(key, 4 * num_layers)
    for layer in range(num_layers):
        k0, k1, k2, k3 = keys[4 * layer: 4 * layer + 4]
        params[f"w_ih_l{layer}"] = jax.random.uniform(k0, (dim, 3 * dim), dtype, -lim, lim)
        params[f"w_hh_l{layer}"] = jax.random.uniform(k1, (dim, 3 * dim), dtype, -lim, lim)
        params[f"b_ih_l{layer}"] = jax.random.uniform(k2, (3 * dim,), dtype, -lim, lim)
        params[f"b_hh_l{layer}"] = jax.random.uniform(k3, (3 * dim,), dtype, -lim, lim)
    return params


def gru_layer_ref(x, params, eps=1e-5):
    B, C, T = x.shape
    H = C
    xt = jnp.transpose(x, (0, 2, 1))                        # [B, T, C]
    mean = jnp.mean(xt, axis=-1, keepdims=True)
    var = jnp.mean((xt - mean) ** 2, axis=-1, keepdims=True)
    xn = (xt - mean) / jnp.sqrt(var + eps)
    xn = xn * params["ln_gamma"] + params["ln_beta"]

    layer_in = xn
    for layer in range(params["num_layers"]):
        w_ih = params[f"w_ih_l{layer}"]
        w_hh = params[f"w_hh_l{layer}"]
        b_ih = params[f"b_ih_l{layer}"]
        b_hh = params[f"b_hh_l{layer}"]

        def step(h, x_t):
            gx = x_t @ w_ih + b_ih
            gh = h @ w_hh + b_hh
            r = jax.nn.sigmoid(gx[:, :H] + gh[:, :H])
            z = jax.nn.sigmoid(gx[:, H:2 * H] + gh[:, H:2 * H])
            n = jnp.tanh(gx[:, 2 * H:] + r * gh[:, 2 * H:])
            h_new = (1.0 - z) * n + z * h
            return h_new, h_new

        h0 = jnp.zeros((B, H), layer_in.dtype)
        xs = jnp.transpose(layer_in, (1, 0, 2))             # [T, B, D]
        _, hs = jax.lax.scan(step, h0, xs)                  # [T, B, H]
        layer_in = jnp.transpose(hs, (1, 0, 2))             # [B, T, H]
    return jnp.transpose(layer_in, (0, 2, 1))               # [B, H, T]


if __name__ == "__main__":
    key = jax.random.PRNGKey(0)
    k_param, k_x = jax.random.split(key)

    dim = 256       # module default (nn.LayerNorm(256), nn.GRU(256, 256, num_layers=2))
    layers = 2
    batch, seq = 2, 10

    params = init_params(k_param, dim, layers)
    x = jax.random.normal(k_x, (batch, dim, seq), dtype=jnp.float32)   # [B, C, T]

    ref = gru_layer_ref(x, params)

    # f32 compute path: tight tolerance vs the pure-JAX reference (single time chunk).
    out_f32 = jax.block_until_ready(
        gru_layer_forward(x, params, compute_dtype=jnp.float32))
    assert out_f32.shape == (batch, dim, seq), out_f32.shape
    err_f32 = float(jnp.max(jnp.abs(out_f32 - ref)))
    assert jnp.allclose(out_f32, ref, atol=2e-3, rtol=2e-3), err_f32

    # Default bf16 MXU-operand path, exercising multi-chunk recurrence + time padding
    # (tc=4 -> 3 chunks over T_pad=12). Looser tolerance for bf16 matmul operands.
    out_bf16 = jax.block_until_ready(
        gru_layer_forward(x, params, compute_dtype=jnp.bfloat16, tc=4))
    err_bf16 = float(jnp.max(jnp.abs(out_bf16 - ref)))
    assert jnp.allclose(out_bf16, ref, atol=5e-2, rtol=5e-2), err_bf16

    print("KERNEL_OK")
</pallas_src>

<mosaic_0001>
module attributes {stable_mosaic.version = 11 : i64} {
  func.func @_proj_kernel(%arg0: i32, %arg1: memref<80x256xf32, #tpu.memory_space<vmem>>, %arg2: memref<1x256xf32, #tpu.memory_space<vmem>>, %arg3: memref<1x256xf32, #tpu.memory_space<vmem>>, %arg4: memref<256x768xf32, #tpu.memory_space<vmem>>, %arg5: memref<1x768xf32, #tpu.memory_space<vmem>>, %arg6: memref<80x768xf32, #tpu.memory_space<vmem>>) attributes {dimension_semantics = [#tpu.dimension_semantics<parallel>], iteration_bounds = array<i64: 1>, scalar_prefetch = 0 : i64, scratch_operands = 0 : i64, tpu.core_type = #tpu.core_type<tc>, window_params = [{transform_indices = @transform_0, window_bounds = array<i64: 80, 256>}, {pipeline_mode = #tpu.pipeline_mode<synchronous>, transform_indices = @transform_1, window_bounds = array<i64: 1, 256>}, {pipeline_mode = #tpu.pipeline_mode<synchronous>, transform_indices = @transform_2, window_bounds = array<i64: 1, 256>}, {pipeline_mode = #tpu.pipeline_mode<synchronous>, transform_indices = @transform_3, window_bounds = array<i64: 256, 768>}, {pipeline_mode = #tpu.pipeline_mode<synchronous>, transform_indices = @transform_4, window_bounds = array<i64: 1, 768>}, {transform_indices = @transform_5, window_bounds = array<i64: 80, 768>}]} {
    %c0 = arith.constant 0 : index
    %c0_0 = arith.constant 0 : index
    %0 = vector.load %arg1[%c0, %c0_0] : memref<80x256xf32, #tpu.memory_space<vmem>>, vector<80x256xf32>
    %cst = arith.constant dense<0.000000e+00> : vector<80xf32>
    %1 = vector.multi_reduction <add>, %0, %cst [1] : vector<80x256xf32> to vector<80xf32>
    %2 = vector.shape_cast %1 : vector<80xf32> to vector<80x1xf32>
    %cst_1 = arith.constant 2.560000e+02 : f32
    %3 = vector.broadcast %cst_1 : f32 to vector<80x1xf32>
    %4 = arith.divf %2, %3 : vector<80x1xf32>
    %5 = vector.broadcast %4 : vector<80x1xf32> to vector<80x256xf32>
    %6 = arith.subf %0, %5 : vector<80x256xf32>
    %7 = arith.mulf %6, %6 : vector<80x256xf32>
    %cst_2 = arith.constant dense<0.000000e+00> : vector<80xf32>
    %8 = vector.multi_reduction <add>, %7, %cst_2 [1] : vector<80x256xf32> to vector<80xf32>
    %9 = vector.shape_cast %8 : vector<80xf32> to vector<80x1xf32>
    %cst_3 = arith.constant 2.560000e+02 : f32
    %10 = vector.broadcast %cst_3 : f32 to vector<80x1xf32>
    %11 = arith.divf %9, %10 : vector<80x1xf32>
    %12 = vector.broadcast %4 : vector<80x1xf32> to vector<80x256xf32>
    %13 = arith.subf %0, %12 : vector<80x256xf32>
    %cst_4 = arith.constant 9.99999974E-6 : f32
    %14 = vector.broadcast %cst_4 : f32 to vector<80x1xf32>
    %15 = arith.addf %11, %14 : vector<80x1xf32>
    %16 = math.rsqrt %15 : vector<80x1xf32>
    %17 = vector.broadcast %16 : vector<80x1xf32> to vector<80x256xf32>
    %18 = arith.mulf %13, %17 : vector<80x256xf32>
    %c0_5 = arith.constant 0 : index
    %c0_6 = arith.constant 0 : index
    %19 = vector.load %arg2[%c0_5, %c0_6] : memref<1x256xf32, #tpu.memory_space<vmem>>, vector<1x256xf32>
    %20 = vector.broadcast %19 : vector<1x256xf32> to vector<80x256xf32>
    %21 = arith.mulf %18, %20 : vector<80x256xf32>
    %c0_7 = arith.constant 0 : index
    %c0_8 = arith.constant 0 : index
    %22 = vector.load %arg3[%c0_7, %c0_8] : memref<1x256xf32, #tpu.memory_space<vmem>>, vector<1x256xf32>
    %23 = vector.broadcast %22 : vector<1x256xf32> to vector<80x256xf32>
    %24 = arith.addf %21, %23 : vector<80x256xf32>
    %c0_9 = arith.constant 0 : index
    %c0_10 = arith.constant 0 : index
    %25 = vector.load %arg4[%c0_9, %c0_10] : memref<256x768xf32, #tpu.memory_space<vmem>>, vector<256x768xf32>
    %cst_11 = arith.constant dense<0.000000e+00> : vector<80x768xf32>
    %26 = tpu.matmul %24, %25, %cst_11 {dimension_numbers = #tpu.dot_dimension_numbers<[1], [0], [0], [1], [0, 0, 1, 1], [], []>} : vector<80x256xf32>, vector<256x768xf32>, vector<80x768xf32> -> vector<80x768xf32>
    %c0_12 = arith.constant 0 : index
    %c0_13 = arith.constant 0 : index
    %27 = vector.load %arg5[%c0_12, %c0_13] : memref<1x768xf32, #tpu.memory_space<vmem>>, vector<1x768xf32>
    %28 = vector.broadcast %27 : vector<1x768xf32> to vector<80x768xf32>
    %29 = arith.addf %26, %28 : vector<80x768xf32>
    %c0_14 = arith.constant 0 : index
    %c0_15 = arith.constant 0 : index
    %30 = vector.load %arg6[%c0_14, %c0_15] : memref<80x768xf32, #tpu.memory_space<vmem>>, vector<80x768xf32>
    tpu.vector_store %arg6[%c0_14, %c0_15], %29 {strides = array<i32>} : memref<80x768xf32, #tpu.memory_space<vmem>>, vector<80x768xf32>,
    return
  }
  func.func @transform_0(%arg0: i32) -> (i32, i32) {
    %c0_i32 = arith.constant 0 : i32
    %c0_i32_0 = arith.constant 0 : i32
    return %arg0, %c0_i32 : i32, i32
  }
  func.func @transform_1(%arg0: i32) -> (i32, i32) {
    %c0_i32 = arith.constant 0 : i32
    %c0_i32_0 = arith.constant 0 : i32
    %c0_i32_1 = arith.constant 0 : i32
    return %c0_i32, %c0_i32_0 : i32, i32
  }
  func.func @transform_2(%arg0: i32) -> (i32, i32) {
    %c0_i32 = arith.constant 0 : i32
    %c0_i32_0 = arith.constant 0 : i32
    %c0_i32_1 = arith.constant 0 : i32
    return %c0_i32, %c0_i32_0 : i32, i32
  }
  func.func @transform_3(%arg0: i32) -> (i32, i32) {
    %c0_i32 = arith.constant 0 : i32
    %c0_i32_0 = arith.constant 0 : i32
    %c0_i32_1 = arith.constant 0 : i32
    return %c0_i32, %c0_i32_0 : i32, i32
  }
  func.func @transform_4(%arg0: i32) -> (i32, i32) {
    %c0_i32 = arith.constant 0 : i32
    %c0_i32_0 = arith.constant 0 : i32
    %c0_i32_1 = arith.constant 0 : i32
    return %c0_i32, %c0_i32_0 : i32, i32
  }
  func.func @transform_5(%arg0: i32) -> (i32, i32) {
    %c0_i32 = arith.constant 0 : i32
    %c0_i32_0 = arith.constant 0 : i32
    return %arg0, %c0_i32 : i32, i32
  }
}

</mosaic_0001>

<bundles_post_ra>
// kernel: tpu_custom_call.1
= control target key start
LH: loop header
LB: loop body
LE: loop exit
PB: predicated region body
PF: predicated region fallthrough
CT: control target
= control target key end

     0   :  { %10 = vsyncpa [#allocation3], 0  ;;  %s2064_s0 = inlined_call_operand.hbm [shape: f32[80,256], index: 0, kind: input, shape index: {}]   ;;  %s2065_s1 = inlined_call_operand.hbm [shape: f32[1,256], index: 1, kind: input, shape index: {}]   ;;  %s2066_s2 = inlined_call_operand.hbm [shape: f32[1,256], index: 2, kind: input, shape index: {}]   ;;  %s2067_s3 = inlined_call_operand.hbm [shape: f32[256,768], index: 3, kind: input, shape index: {}]   ;;  %s2068_s4 = inlined_call_operand.hbm [shape: f32[1,768], index: 4, kind: input, shape index: {}]   ;;  %s2069_s5 = inlined_call_operand.hbm [shape: f32[80,768], index: 5, kind: output, shape index: {}]  }
   0x1   :  { %11 = vsyncpa [#allocation6], 0 }
   0x2   :  { %12 = vsyncpa [#allocation9], 0  ;;  %s32_s20 = sshll.u32 %s2065_s1, 4  ;;  %s33_s20 = int_to_ptr.hbm [resolvable:$true] %s32_s20 }
   0x3   :  { %13 = vsyncpa [#allocation4], 0  ;;  %s1458_s21 = smov [#allocation5]   ;;  %s53_s25 = sshll.u32 %s2067_s3, 4  ;;  %s54_s25 = int_to_ptr.hbm [resolvable:$true] %s53_s25 }
   0x4   :  { %s34_s22 = sshll.u32 %s1458_s21, 4  ;;  %s1459_s26 = smov [#allocation8]   ;;  %s35_s22 = int_to_ptr.vmem [resolvable:$true] %s34_s22 }
   0x5   :  { %37 = dma.hbm_to_vmem [thread:$0]  %s33_s20, 32, %s35_s22, [#allocation6]  }
   0x6   :  { %s55_s27 = sshll.u32 %s1459_s26, 4  ;;  %s1460_s28 = smov 768   ;;  %s56_s27 = int_to_ptr.vmem [resolvable:$true] %s55_s27 }
   0x7   :  { %s1461_s29 = smov 48   ;;  %s18_s6 = sshll.u32 %s2064_s0, 4  ;;  %s19_s6 = int_to_ptr.hbm [resolvable:$true] %s18_s6 }
   0x8   :  { %61 = dma.hbm_to_vmem [thread:$0]  %s54_s25, 24576, %s56_s27, [#allocation9], %s1460_s28, %s1460_s28, %s1461_s29  }
   0x9   :  { %s1462_s7 = smov [#allocation2]   ;;  %s43_s10 = sshll.u32 %s2066_s2, 4  ;;  %s44_s10 = int_to_ptr.hbm [resolvable:$true] %s43_s10 }
   0xa   :  { %s20_s8 = sshll.u32 %s1462_s7, 4  ;;  %s1463_s11 = smov 256   ;;  %s21_s8 = int_to_ptr.vmem [resolvable:$true] %s20_s8 }
   0xb   :  { %s1464_s12 = smov 16   ;;  %s1465_s13 = smov [#allocation7]  }
   0xc   :  { %26 = dma.hbm_to_vmem [thread:$0]  %s19_s6, 2560, %s21_s8, [#allocation3], %s1463_s11, %s1463_s11, %s1464_s12  }
   0xd   :  { %s45_s14 = sshll.u32 %s1465_s13, 4  ;;  %s67_s17 = sshll.u32 %s2068_s4, 4  ;;  %s46_s14 = int_to_ptr.vmem [resolvable:$true] %s45_s14  ;;  %s68_s17 = int_to_ptr.hbm [resolvable:$true] %s67_s17 }
   0xe   :  { %48 = dma.hbm_to_vmem [thread:$0]  %s44_s10, 32, %s46_s14, [#allocation6]  }
   0xf   :  { %s1466_s0 = smov [#allocation10]  }
  0x10   :  { %s69_s18 = sshll.u32 %s1466_s0, 4  ;;  %s70_s18 = int_to_ptr.vmem [resolvable:$true] %s69_s18 }
  0x11   :  { %72 = dma.hbm_to_vmem [thread:$0]  %s68_s17, 96, %s70_s18, [#allocation9]  }
  0x12   :  { %1450 = dma.done.wait [#allocation3], 2560  }
  0x13   :  { %1451 = vsyncadd [#allocation3], 4294964736 }
  0x14   :  { %1452 = dma.done.wait [#allocation6], 64  }
  0x15   :  { %1453 = vsyncadd [#allocation6], 4294967232 }
  0x16   :  { %1454 = dma.done.wait [#allocation9], 24672  }
  0x17   :  { %1455 = vsyncadd [#allocation9], 4294942624  ;;  %v101_v0 = vld [vmem:[#allocation2 + $0x40] sm:$0xff]  ;;  %v102_v1 = vld [vmem:[#allocation2 + $0x48] sm:$0xff]  ;;  %v1467_v24 = vmov 256.0   ;;  %s1468_s2 = smov [#allocation11]  }
  0x18   :  { %v97_v2 = vld [vmem:[#allocation2 + $0x20] sm:$0xff]  ;;  %v125_v3 = vadd.f32 %v102_v1, %v101_v0  ;;  %v98_v4 = vld [vmem:[#allocation2 + $0x28] sm:$0xff]  ;;  %v1517_v9 = vld [vmem:[#allocation2 + $0x50] sm:$0xff]  ;;  %1284 = vrcp.f32 %v1467_v24  ;;  %s1256_s4 = sshll.u32 %s1468_s2, 4  ;;  %s1258_s21 = sshll.u32 %s2069_s5, 4  ;;  %s1257_s4 = int_to_ptr.vmem [resolvable:$true] %s1256_s4  ;;  %s1259_s21 = int_to_ptr.hbm [resolvable:$true] %s1258_s21 }
  0x19   :  { %v93_v5 = vld [vmem:[#allocation2] sm:$0xff]  ;;  %v94_v6 = vld [vmem:[#allocation2 + $0x8] sm:$0xff]  ;;  %v119_v7 = vadd.f32 %v98_v4, %v97_v2  ;;  %v1519_v10 = vld [vmem:[#allocation2 + $0x58] sm:$0xff] }
  0x1a   :  { %v113_v8 = vadd.f32 %v94_v6, %v93_v5  ;;  %126 = vadd.xlane.f32.xlu2 %v125_v3  ;;  %v1521_v11 = vld [vmem:[#allocation2 + $0x10] sm:$0xff]  ;;  %v1523_v12 = vld [vmem:[#allocation2 + $0x18] sm:$0xff]  ;;  %v128_v15 = vadd.f32 %v1519_v10, %v1517_v9  ;;  %v1539_v20 = vld [vmem:[#allocation2 + $0x60] sm:$0xff] }
  0x1b   :  { %120 = vadd.xlane.f32.xlu1 %v119_v7  ;;  %v1525_v13 = vld [vmem:[#allocation2 + $0x30] sm:$0xff]  ;;  %v1527_v14 = vld [vmem:[#allocation2 + $0x38] sm:$0xff]  ;;  %v116_v16 = vadd.f32 %v1523_v12, %v1521_v11  ;;  %v1541_v21 = vld [vmem:[#allocation2 + $0x68] sm:$0xff] }
  0x1c   :  { %114 = vadd.xlane.f32.xlu0 %v113_v8  ;;  %v122_v17 = vadd.f32 %v1527_v14, %v1525_v13  ;;  %v1535_v18 = vld [vmem:[#allocation2 + $0x70] sm:$0xff]  ;;  %v1537_v19 = vld [vmem:[#allocation2 + $0x78] sm:$0xff]  ;;  %v131_v23 = vadd.f32 %v1541_v21, %v1539_v20  ;;  %v506_v45 = vld [vmem:[#allocation8 + $0x2a0] sm:$0xff] }
  0x1d   :  { %v134_v22 = vadd.f32 %v1537_v19, %v1535_v18  ;;  %v512_v37 = vld [vmem:[#allocation8 + $0x2d0] sm:$0xff]  ;;  %v513_v39 = vld [vmem:[#allocation8 + $0x2d8] sm:$0xff]  ;;  %v602_v46 = vld [vmem:[#allocation8 + $0x5a0] sm:$0xff] }
  0x1e   :  { %v1285_v25 = vpop.eup %1284  ;;  %v608_v38 = vld [vmem:[#allocation8 + $0x5d0] sm:$0xff]  ;;  %628 = vmatpush.msra.mxu0 %v512_v37  ;;  %v609_v44 = vld [vmem:[#allocation8 + $0x5d8] sm:$0xff]  ;;  %722 = vmatpush.msra.mxu2 %v513_v39  ;;  %v507_v49 = vld [vmem:[#allocation8 + $0x2a8] sm:$0xff] }
  0x1f   :  { %v144_v26 = vmul.f32 256.0, %v1285_v25  ;;  %vm148_vm0 = vweird.f32 %v1285_v25  ;;  %675 = vmatpush.msra.mxu1 %v608_v38  ;;  %v603_v50 = vld [vmem:[#allocation8 + $0x5a8] sm:$0xff]  ;;  %769 = vmatpush.msra.mxu3 %v609_v44  ;;  %v500_v38 = vld [vmem:[#allocation8 + $0x270] sm:$0xff]  ;;  %v501_v44 = vld [vmem:[#allocation8 + $0x278] sm:$0xff] }
  0x20   :  { %629 = vmatpush.msra.mxu0 %v506_v45  ;;  %723 = vmatpush.msra.mxu2 %v507_v49  ;;  %v596_v39 = vld [vmem:[#allocation8 + $0x570] sm:$0xff]  ;;  %v597_v45 = vld [vmem:[#allocation8 + $0x578] sm:$0xff]  ;;  %v590_v49 = vld [vmem:[#allocation8 + $0x540] sm:$0xff] }
  0x21   :  { %v145_v27 = vsub.f32 1.0, %v144_v26  ;;  %676 = vmatpush.msra.mxu1 %v602_v46  ;;  %770 = vmatpush.msra.mxu3 %v603_v50  ;;  %v1613_v26 = vld [vmem:[#allocation2 + $0x90] sm:$0xff]  ;;  %v494_v46 = vld [vmem:[#allocation8 + $0x240] sm:$0xff] }
  0x22   :  { %129 = vadd.xlane.f32.xlu2 %v128_v15  ;;  %630 = vmatpush.msra.mxu0 %v500_v38  ;;  %v495_v50 = vld [vmem:[#allocation8 + $0x248] sm:$0xff]  ;;  %v537_v38 = vld [vmem:[#allocation8 + $0x398] sm:$0xff] }
  0x23   :  { %123 = vadd.xlane.f32.xlu1 %v122_v17  ;;  %v146_v28 = vmul.f32 %v1285_v25, %v145_v27  ;;  %v1615_v27 = vld [vmem:[#allocation2 + $0x98] sm:$0xff]  ;;  %677 = vmatpush.msra.mxu1 %v596_v39  ;;  %v434_v39 = vld [vmem:[#allocation8 + $0x60] sm:$0xff] }
  0x24   :  { %117 = vadd.xlane.f32.xlu0 %v116_v16  ;;  %724 = vmatpush.msra.mxu2 %v501_v44  ;;  %v530_v44 = vld [vmem:[#allocation8 + $0x360] sm:$0xff] }
  0x25   :  { %v147_v29 = vadd.f32 %v1285_v25, %v146_v28  ;;  %771 = vmatpush.msra.mxu3 %v597_v45  ;;  %631 = vmatpush.msra.mxu0 %v494_v46  ;;  %v435_v45 = vld [vmem:[#allocation8 + $0x68] sm:$0xff] }
  0x26   :  { %678 = vmatpush.msra.mxu1 %v590_v49  ;;  %725 = vmatpush.msra.mxu2 %v495_v50  ;;  %v531_v46 = vld [vmem:[#allocation8 + $0x368] sm:$0xff] }
  0x27   :  { %v1547_v30 = vsel %vm148_vm0, %v1285_v25, %v147_v29 }
  0x2a   :  { %135 = vadd.xlane.f32.xlu2 %v134_v22 }
  0x2c   :  { %132 = vadd.xlane.f32.xlu0 %v131_v23 }
  0x8d   :  { %v127_v31 = vpop.xlane.xlu2 %126 }
  0x8e   :  { %v154_v32 = vmul.f32 %v1547_v30, %v127_v31  ;;  %v121_v33 = vpop.xlane.xlu1 %120 }
  0x8f   :  { %v115_v34 = vpop.xlane.xlu0 %114  ;;  %v152_v35 = vmul.f32 %v1547_v30, %v121_v33 }
  0x90   :  { %v150_v36 = vmul.f32 %v1547_v30, %v115_v34  ;;  %v1560_v47 = vsub.f32 %v101_v0, %v154_v32  ;;  %v1562_v48 = vsub.f32 %v102_v1, %v154_v32  ;;  %v1578_v0 = vld [vmem:[#allocation2 + $0x80] sm:$0xff]  ;;  %v1580_v1 = vld [vmem:[#allocation2 + $0x88] sm:$0xff] }
  0x91   :  { %v1552_v40 = vsub.f32 %v97_v2, %v152_v35  ;;  %v1554_v41 = vsub.f32 %v98_v4, %v152_v35  ;;  %v140_v35 = vadd.f32 %v1615_v27, %v1613_v26 }
  0x92   :  { %v1556_v42 = vsub.f32 %v93_v5, %v150_v36  ;;  %v1558_v43 = vsub.f32 %v94_v6, %v150_v36  ;;  %v188_v60 = vmul.f32 %v1560_v47, %v1560_v47  ;;  %v189_v61 = vmul.f32 %v1562_v48, %v1562_v48 }
  0x93   :  { %v184_v51 = vmul.f32 %v1552_v40, %v1552_v40  ;;  %v185_v52 = vmul.f32 %v1554_v41, %v1554_v41  ;;  %v137_v5 = vadd.f32 %v1580_v1, %v1578_v0 }
  0x94   :  { %v180_v53 = vmul.f32 %v1556_v42, %v1556_v42  ;;  %v181_v54 = vmul.f32 %v1558_v43, %v1558_v43  ;;  %v212_v4 = vadd.f32 %v189_v61, %v188_v60  ;;  %v476_v60 = vld [vmem:[#allocation8 + $0x1b0] sm:$0xff] }
  0x95   :  { %v130_v55 = vpop.xlane.xlu2 %129  ;;  %v206_v56 = vadd.f32 %v185_v52, %v184_v51  ;;  %v591_v51 = vld [vmem:[#allocation8 + $0x548] sm:$0xff]  ;;  %v488_v52 = vld [vmem:[#allocation8 + $0x210] sm:$0xff] }
  0x96   :  { %v200_v57 = vadd.f32 %v181_v54, %v180_v53  ;;  %v124_v59 = vpop.xlane.xlu1 %123  ;;  %v155_v23 = vmul.f32 %v1547_v30, %v130_v55  ;;  %772 = vmatpush.msra.mxu3 %v591_v51  ;;  %v584_v53 = vld [vmem:[#allocation8 + $0x510] sm:$0xff]  ;;  %v489_v54 = vld [vmem:[#allocation8 + $0x218] sm:$0xff]  ;;  %632 = vmatpush.msra.mxu0 %v488_v52 }
  0x97   :  { %v118_v58 = vpop.xlane.xlu0 %117  ;;  %207 = vadd.xlane.f32.xlu2 %v206_v56  ;;  %v153_v63 = vmul.f32 %v1547_v30, %v124_v59  ;;  %679 = vmatpush.msra.mxu1 %v584_v53  ;;  %v585_v55 = vld [vmem:[#allocation8 + $0x518] sm:$0xff]  ;;  %v482_v56 = vld [vmem:[#allocation8 + $0x1e0] sm:$0xff]  ;;  %v579_v59 = vld [vmem:[#allocation8 + $0x4e8] sm:$0xff] }
  0x98   :  { %v151_v62 = vmul.f32 %v1547_v30, %v118_v58  ;;  %201 = vadd.xlane.f32.xlu1 %v200_v57  ;;  %v1631_v33 = vsub.f32 %v1519_v10, %v155_v23  ;;  %726 = vmatpush.msra.mxu2 %v489_v54  ;;  %v578_v57 = vld [vmem:[#allocation8 + $0x4e0] sm:$0xff]  ;;  %v483_v58 = vld [vmem:[#allocation8 + $0x1e8] sm:$0xff]  ;;  %v572_v61 = vld [vmem:[#allocation8 + $0x4b0] sm:$0xff] }
  0x99   :  { %v1591_v6 = vsub.f32 %v1525_v13, %v153_v63  ;;  %v1594_v7 = vsub.f32 %v1527_v14, %v153_v63  ;;  %773 = vmatpush.msra.mxu3 %v585_v55  ;;  %633 = vmatpush.msra.mxu0 %v482_v56  ;;  %v573_v63 = vld [vmem:[#allocation8 + $0x4b8] sm:$0xff] }
  0x9a   :  { %v1583_v2 = vsub.f32 %v1521_v11, %v151_v62  ;;  %v1586_v3 = vsub.f32 %v1523_v12, %v151_v62  ;;  %v191_v10 = vmul.f32 %v1631_v33, %v1631_v33  ;;  %680 = vmatpush.msra.mxu1 %v578_v57  ;;  %727 = vmatpush.msra.mxu2 %v483_v58  ;;  %v477_v62 = vld [vmem:[#allocation8 + $0x1b8] sm:$0xff] }
  0x9b   :  { %v186_v13 = vmul.f32 %v1591_v6, %v1591_v6  ;;  %v187_v14 = vmul.f32 %v1594_v7, %v1594_v7  ;;  %774 = vmatpush.msra.mxu3 %v579_v59  ;;  %634 = vmatpush.msra.mxu0 %v476_v60  ;;  %v428_v60 = vld [vmem:[#allocation8 + $0x30] sm:$0xff] }
  0x9c   :  { %v182_v8 = vmul.f32 %v1583_v2, %v1583_v2  ;;  %v183_v11 = vmul.f32 %v1586_v3, %v1586_v3  ;;  %681 = vmatpush.msra.mxu1 %v572_v61  ;;  %728 = vmatpush.msra.mxu2 %v477_v62  ;;  %v524_v61 = vld [vmem:[#allocation8 + $0x330] sm:$0xff]  ;;  %v429_v62 = vld [vmem:[#allocation8 + $0x38] sm:$0xff] }
  0x9d   :  { %v136_v15 = vpop.xlane.xlu2 %135  ;;  %v209_v32 = vadd.f32 %v187_v14, %v186_v13  ;;  %775 = vmatpush.msra.mxu3 %v573_v63  ;;  %v554_v13 = vld [vmem:[#allocation8 + $0x420] sm:$0xff]  ;;  %v459_v14 = vld [vmem:[#allocation8 + $0x128] sm:$0xff] }
  0x9e   :  { %v203_v16 = vadd.f32 %v183_v11, %v182_v8  ;;  %v157_v12 = vmul.f32 %v1547_v30, %v136_v15  ;;  %v471_v8 = vld [vmem:[#allocation8 + $0x188] sm:$0xff]  ;;  %v464_v15 = vld [vmem:[#allocation8 + $0x150] sm:$0xff] }
  0x9f   :  { %v133_v17 = vpop.xlane.xlu0 %132  ;;  %213 = vadd.xlane.f32.xlu2 %v212_v4  ;;  %v470_v4 = vld [vmem:[#allocation8 + $0x180] sm:$0xff]  ;;  %v567_v11 = vld [vmem:[#allocation8 + $0x488] sm:$0xff]  ;;  %729 = vmatpush.msra.mxu2 %v471_v8  ;;  %v525_v8 = vld [vmem:[#allocation8 + $0x338] sm:$0xff] }
  0xa0   :  { %138 = vadd.xlane.f32.xlu1 %v137_v5  ;;  %v156_v22 = vmul.f32 %v1547_v30, %v133_v17  ;;  %v1608_v24 = vsub.f32 %v1535_v18, %v157_v12  ;;  %v1611_v25 = vsub.f32 %v1537_v19, %v157_v12  ;;  %204 = vadd.xlane.f32.xlu0 %v203_v16  ;;  %v566_v5 = vld [vmem:[#allocation8 + $0x480] sm:$0xff]  ;;  %v560_v16 = vld [vmem:[#allocation8 + $0x450] sm:$0xff]  ;;  %v465_v12 = vld [vmem:[#allocation8 + $0x158] sm:$0xff] }
  0xa1   :  { %v1628_v19 = vsub.f32 %v1517_v9, %v155_v23  ;;  %635 = vmatpush.msra.mxu0 %v470_v4  ;;  %682 = vmatpush.msra.mxu1 %v566_v5  ;;  %v561_v17 = vld [vmem:[#allocation8 + $0x458] sm:$0xff]  ;;  %v555_v23 = vld [vmem:[#allocation8 + $0x428] sm:$0xff] }
  0xa2   :  { %v194_v28 = vmul.f32 %v1608_v24, %v1608_v24  ;;  %v195_v29 = vmul.f32 %v1611_v25, %v1611_v25  ;;  %v1622_v31 = vsub.f32 %v1539_v20, %v156_v22  ;;  %v1625_v18 = vsub.f32 %v1541_v21, %v156_v22  ;;  %776 = vmatpush.msra.mxu3 %v567_v11  ;;  %v458_v22 = vld [vmem:[#allocation8 + $0x120] sm:$0xff] }
  0xa3   :  { %v190_v9 = vmul.f32 %v1628_v19, %v1628_v19  ;;  %636 = vmatpush.msra.mxu0 %v464_v15  ;;  %683 = vmatpush.msra.mxu1 %v560_v16 }
  0xa4   :  { %v221_v34 = vadd.f32 %v195_v29, %v194_v28  ;;  %v192_v20 = vmul.f32 %v1622_v31, %v1622_v31  ;;  %v193_v21 = vmul.f32 %v1625_v18, %v1625_v18  ;;  %730 = vmatpush.msra.mxu2 %v465_v12  ;;  %777 = vmatpush.msra.mxu3 %v561_v17  ;;  %v452_v28 = vld [vmem:[#allocation8 + $0xf0] sm:$0xff]  ;;  %v422_v17 = vld [vmem:[#allocation8] sm:$0xff] }
  0xa5   :  { %v215_v37 = vadd.f32 %v191_v10, %v190_v9  ;;  %637 = vmatpush.msra.mxu0 %v458_v22  ;;  %684 = vmatpush.msra.mxu1 %v554_v13  ;;  %v548_v29 = vld [vmem:[#allocation8 + $0x3f0] sm:$0xff]  ;;  %v543_v9 = vld [vmem:[#allocation8 + $0x3c8] sm:$0xff]  ;;  %v518_v22 = vld [vmem:[#allocation8 + $0x300] sm:$0xff] }
  0xa6   :  { %v218_v36 = vadd.f32 %v193_v21, %v192_v20  ;;  %731 = vmatpush.msra.mxu2 %v459_v14  ;;  %778 = vmatpush.msra.mxu3 %v555_v23  ;;  %v542_v20 = vld [vmem:[#allocation8 + $0x3c0] sm:$0xff]  ;;  %v447_v21 = vld [vmem:[#allocation8 + $0xc8] sm:$0xff]  ;;  %v440_v10 = vld [vmem:[#allocation8 + $0x90] sm:$0xff] }
  0xa7   :  { %222 = vadd.xlane.f32.xlu2 %v221_v34  ;;  %638 = vmatpush.msra.mxu0 %v452_v28  ;;  %v549_v34 = vld [vmem:[#allocation8 + $0x3f8] sm:$0xff] }
  0xa8   :  { %210 = vadd.xlane.f32.xlu1 %v209_v32  ;;  %141 = vadd.xlane.f32.xlu0 %v140_v35  ;;  %v453_v32 = vld [vmem:[#allocation8 + $0xf8] sm:$0xff]  ;;  %v446_v35 = vld [vmem:[#allocation8 + $0xc0] sm:$0xff] }
  0xa9   :  { %685 = vmatpush.msra.mxu1 %v548_v29  ;;  %732 = vmatpush.msra.mxu2 %v453_v32 }
  0xaa   :  { %779 = vmatpush.msra.mxu3 %v549_v34  ;;  %639 = vmatpush.msra.mxu0 %v446_v35 }
  0xab   :  { %686 = vmatpush.msra.mxu1 %v542_v20  ;;  %733 = vmatpush.msra.mxu2 %v447_v21 }
  0xac   :  { %780 = vmatpush.msra.mxu3 %v543_v9  ;;  %640 = vmatpush.msra.mxu0 %v440_v10  ;;  %v370_v10 = vld [vmem:[#allocation5] sm:$0x3] }
  0xae   :  { %781 = vmatpush.msra.mxu3 %v537_v38  ;;  %641 = vmatpush.msra.mxu0 %v434_v39 }
  0xb0   :  { %219 = vadd.xlane.f32.xlu1 %v218_v36  ;;  %216 = vadd.xlane.f32.xlu0 %v215_v37  ;;  %v536_v36 = vld [vmem:[#allocation8 + $0x390] sm:$0xff]  ;;  %v441_v37 = vld [vmem:[#allocation8 + $0x98] sm:$0xff] }
  0xb1   :  { %687 = vmatpush.msra.mxu1 %v536_v36  ;;  %734 = vmatpush.msra.mxu2 %v441_v37 }
  0xb2   :  { %782 = vmatpush.msra.mxu3 %v531_v46  ;;  %642 = vmatpush.msra.mxu0 %v428_v60 }
  0xb3   :  { %688 = vmatpush.msra.mxu1 %v530_v44  ;;  %735 = vmatpush.msra.mxu2 %v435_v45  ;;  %v396_v44 = vld [vmem:[#allocation7] sm:$0x3] }
  0xb4   :  { %783 = vmatpush.msra.mxu3 %v525_v8  ;;  %643 = vmatpush.msra.mxu0 %v422_v17 }
  0xb5   :  { %689 = vmatpush.msra.mxu1 %v524_v61  ;;  %736 = vmatpush.msra.mxu2 %v429_v62 }
  0xb7   :  { %690 = vmatpush.msra.mxu1 %v518_v22 }
 0x10a   :  { %v208_v49 = vpop.xlane.xlu2 %207 }
 0x10b   :  { %v202_v50 = vpop.xlane.xlu1 %201  ;;  %v232_v51 = vmul.f32 %v208_v49, %v1547_v30  ;;  %v1676_v49 = vperm.slane %v370_v10, 0 }
 0x10c   :  { %v230_v52 = vmul.f32 %v202_v50, %v1547_v30  ;;  %v1678_v50 = vperm.slane %v370_v10, 1 }
 0x10d   :  { %v1645_v53 = vadd.f32 1e-05, %v232_v51 }
 0x10e   :  { %v240_v54 = vadd.f32 1e-05, %v230_v52 }
 0x10f   :  { %1286 = vrsqrt.f32 %v1645_v53  ;;  %vm276_vm4 = vweird.f32 %v1645_v53 }
 0x110   :  { %1288 = vrsqrt.f32 %v240_v54  ;;  %vm256_vm2 = vweird.f32 %v240_v54 }
 0x112   :  { %v214_v56 = vpop.xlane.xlu2 %213 }
 0x113   :  { %v139_v55 = vpop.xlane.xlu1 %138  ;;  %v205_v58 = vpop.xlane.xlu0 %204  ;;  %v234_v16 = vmul.f32 %v214_v56, %v1547_v30  ;;  %v1681_v56 = vperm.slane %v396_v44, 0 }
 0x114   :  { %v158_v57 = vmul.f32 %v1547_v30, %v139_v55  ;;  %v231_v59 = vmul.f32 %v205_v58, %v1547_v30 }
 0x115   :  { %v1650_v63 = vpop.eup %1286  ;;  %v1669_v32 = vadd.f32 1e-05, %v234_v16 }
 0x116   :  { %v1653_v4 = vsub.f32 %v1578_v0, %v158_v57  ;;  %v1656_v5 = vsub.f32 %v1580_v1, %v158_v57  ;;  %v1289_v11 = vpop.eup %1288  ;;  %v271_v15 = vmul.f32 %v1650_v63, %v1645_v53  ;;  %v1661_v12 = vadd.f32 1e-05, %v231_v59  ;;  %v423_v0 = vld [vmem:[#allocation8 + $0x8] sm:$0xff] }
 0x117   :  { %v251_v13 = vmul.f32 %v1289_v11, %v240_v54  ;;  %v519_v1 = vld [vmem:[#allocation8 + $0x308] sm:$0xff]  ;;  %737 = vmatpush.msra.mxu2 %v423_v0  ;;  %vm257_vm1 = vweird.f32 %v1289_v11  ;;  %v1683_v57 = vperm.slane %v396_v44, 1  ;;  %vm277_vm5 = vweird.f32 %v1650_v63 }
 0x118   :  { %1290 = vrsqrt.f32 %v1661_v12  ;;  %v196_v14 = vmul.f32 %v1653_v4, %v1653_v4  ;;  %784 = vmatpush.msra.mxu3 %v519_v1  ;;  %v272_v23 = vmul.f32 %v1650_v63, %v271_v15  ;;  %v197_v29 = vmul.f32 %v1656_v5, %v1656_v5  ;;  %vm258_vm3 = vmor %vm256_vm2, %vm257_vm1 }
 0x119   :  { %v252_v28 = vmul.f32 %v1289_v11, %v251_v13  ;;  %1292 = vrsqrt.f32 %v1669_v32  ;;  %vm278_vm7 = vmor %vm276_vm4, %vm277_vm5  ;;  %vm266_vm8 = vweird.f32 %v1661_v12  ;;  %vm296_vm13 = vweird.f32 %v1669_v32 }
 0x11a   :  { %v224_v9 = vadd.f32 %v197_v29, %v196_v14  ;;  %v273_v36 = vmul.f32 0.5, %v272_v23  ;;  %v223_v23 = vpop.xlane.xlu2 %222 }
 0x11b   :  { %v211_v34 = vpop.xlane.xlu1 %210  ;;  %v253_v35 = vmul.f32 0.5, %v252_v28  ;;  %v142_v21 = vpop.xlane.xlu0 %141 }
 0x11c   :  { %v233_v20 = vmul.f32 %v211_v34, %v1547_v30  ;;  %225 = vadd.xlane.f32.xlu0 %v224_v9  ;;  %v274_v51 = vsub.f32 1.5, %v273_v36  ;;  %v159_v22 = vmul.f32 %v1547_v30, %v142_v21  ;;  %v237_v36 = vmul.f32 %v223_v23, %v1547_v30 }
 0x11d   :  { %v254_v37 = vsub.f32 1.5, %v253_v35 }
 0x11e   :  { %v1672_v38 = vadd.f32 1e-05, %v233_v20  ;;  %v1291_v39 = vpop.eup %1290  ;;  %v275_v15 = vmul.f32 %v1650_v63, %v274_v51  ;;  %v1716_v21 = vsub.f32 %v1613_v26, %v159_v22 }
 0x11f   :  { %v255_v45 = vmul.f32 %v1289_v11, %v254_v37  ;;  %v261_v46 = vmul.f32 %v1291_v39, %v1661_v12  ;;  %v1689_v62 = vpop.eup %1292  ;;  %vm267_vm6 = vweird.f32 %v1291_v39  ;;  %v1724_v37 = vsub.f32 %v1615_v27, %v159_v22 }
 0x120   :  { %1294 = vrsqrt.f32 %v1672_v38  ;;  %v291_v13 = vmul.f32 %v1689_v62, %v1669_v32  ;;  %vm268_vm9 = vmor %vm266_vm8, %vm267_vm6  ;;  %v279_v29 = vsel %vm278_vm7, %v1650_v63, %v275_v15  ;;  %vm286_vm10 = vweird.f32 %v1672_v38 }
 0x121   :  { %v259_v52 = vsel %vm258_vm3, %v1289_v11, %v255_v45  ;;  %v262_v55 = vmul.f32 %v1291_v39, %v261_v46  ;;  %v355_v26 = vmul.f32 %v279_v29, %v1554_v41  ;;  %v199_v41 = vmul.f32 %v1724_v37, %v1724_v37 }
 0x122   :  { %v350_v58 = vmul.f32 %v259_v52, %v1556_v42  ;;  %v351_v54 = vmul.f32 %v259_v52, %v1558_v43  ;;  %v292_v10 = vmul.f32 %v1689_v62, %v291_v13  ;;  %vm297_vm14 = vweird.f32 %v1689_v62 }
 0x123   :  { %v263_v59 = vmul.f32 0.5, %v262_v55  ;;  %v220_v60 = vpop.xlane.xlu1 %219  ;;  %v217_v61 = vpop.xlane.xlu0 %216  ;;  %vm298_vm15 = vmor %vm296_vm13, %vm297_vm14 }
 0x124   :  { %v376_v8 = vmul.f32 %v1676_v49, %v350_v58  ;;  %v377_v11 = vmul.f32 %v1678_v50, %v351_v54  ;;  %v235_v42 = vmul.f32 %v217_v61, %v1547_v30  ;;  %v236_v0 = vmul.f32 %v220_v60, %v1547_v30 }
 0x125   :  { %v264_v16 = vsub.f32 1.5, %v263_v59  ;;  %v293_v46 = vmul.f32 0.5, %v292_v10  ;;  %v381_v58 = vmul.f32 %v1678_v50, %v355_v26  ;;  %v514_v26 = vld [vmem:[#allocation8 + $0x2e0] sm:$0xff] }
 0x126   :  { %v1295_v43 = vpop.eup %1294  ;;  %v1696_v53 = vadd.f32 %v1681_v56, %v376_v8  ;;  %v1699_v17 = vadd.f32 %v1683_v57, %v377_v11  ;;  %v1707_v28 = vadd.f32 1e-05, %v235_v42  ;;  %v1718_v9 = vadd.f32 1e-05, %v236_v0  ;;  %816 = vmatpush.msrb.mxu0 %v514_v26 }
 0x127   :  { %v265_v1 = vmul.f32 %v1291_v39, %v264_v16  ;;  %v281_v14 = vmul.f32 %v1295_v43, %v1672_v38  ;;  %vm287_vm11 = vweird.f32 %v1295_v43  ;;  %v1745_v38 = vadd.f32 1e-05, %v237_v36  ;;  %v611_v36 = vld [vmem:[#allocation8 + $0x5e8] sm:$0xff] }
 0x128   :  { %644 = vmatmul.f32.vlgmr.msra.gmra.mxu0 %v1696_v53  ;;  %691 = vmatmul.f32.vlgmr.msra.gmra.mxu1 %v1699_v17  ;;  %1296 = vrsqrt.f32 %v1707_v28  ;;  %vm288_vm12 = vmor %vm286_vm10, %vm287_vm11  ;;  %v294_v59 = vsub.f32 1.5, %v293_v46  ;;  %v1761_v16 = vadd.f32 %v1683_v57, %v381_v58  ;;  %vm306_vm0 = vweird.f32 %v1707_v28  ;;  %v503_v46 = vld [vmem:[#allocation8 + $0x288] sm:$0xff] }
 0x129   :  { %v269_v34 = vsel %vm268_vm9, %v1291_v39, %v265_v1  ;;  %v282_v35 = vmul.f32 %v1295_v43, %v281_v14  ;;  %738 = vmatmul.f32.vlgmr.msra.gmra.mxu2 %v1696_v53  ;;  %785 = vmatmul.f32.vlgmr.msra.gmra.mxu3 %v1699_v17  ;;  %v354_v39 = vmul.f32 %v279_v29, %v1552_v40  ;;  %1298 = vrsqrt.f32 %v1718_v9 }
 0x12a   :  { %v352_v20 = vmul.f32 %v269_v34, %v1583_v2  ;;  %v353_v12 = vmul.f32 %v269_v34, %v1586_v3  ;;  %v198_v40 = vmul.f32 %v1716_v21, %v1716_v21  ;;  %1300 = vrsqrt.f32 %v1745_v38  ;;  %957 = vmatpush.msrb.mxu3 %v611_v36  ;;  %v484_v36 = vld [vmem:[#allocation8 + $0x1f0] sm:$0xff] }
 0x12b   :  { %v283_v63 = vmul.f32 0.5, %v282_v35  ;;  %v380_v55 = vmul.f32 %v1676_v49, %v354_v39  ;;  %vm316_vm3 = vweird.f32 %v1718_v9  ;;  %vm326_vm6 = vweird.f32 %v1745_v38 }
 0x12c   :  { %v378_v2 = vmul.f32 %v1676_v49, %v352_v20  ;;  %v379_v3 = vmul.f32 %v1678_v50, %v353_v12  ;;  %v227_v54 = vadd.f32 %v199_v41, %v198_v40  ;;  %v610_v40 = vld [vmem:[#allocation8 + $0x5e0] sm:$0xff]  ;;  %v599_v41 = vld [vmem:[#allocation8 + $0x588] sm:$0xff] }
 0x12d   :  { %v284_v44 = vsub.f32 1.5, %v283_v63  ;;  %v1758_v15 = vadd.f32 %v1681_v56, %v380_v55  ;;  %v509_v63 = vld [vmem:[#allocation8 + $0x2b8] sm:$0xff]  ;;  %863 = vmatpush.msrb.mxu1 %v610_v40  ;;  %v604_v55 = vld [vmem:[#allocation8 + $0x5b0] sm:$0xff] }
 0x12e   :  { %v1733_v45 = vadd.f32 %v1681_v56, %v378_v2  ;;  %v1736_v27 = vadd.f32 %v1683_v57, %v379_v3  ;;  %v1297_v52 = vpop.eup %1296  ;;  %228 = vadd.xlane.f32.xlu1 %v227_v54  ;;  %v598_v54 = vld [vmem:[#allocation8 + $0x580] sm:$0xff] }
 0x12f   :  { %v285_v51 = vmul.f32 %v1295_v43, %v284_v44  ;;  %v301_v61 = vmul.f32 %v1297_v52, %v1707_v28  ;;  %v1752_v8 = vpop.eup %1298  ;;  %vm307_vm1 = vweird.f32 %v1297_v52  ;;  %v515_v28 = vld [vmem:[#allocation8 + $0x2e8] sm:$0xff]  ;;  %v605_v44 = vld [vmem:[#allocation8 + $0x5b8] sm:$0xff]  ;;  %864 = vmatpush.msrb.mxu1 %v604_v55 }
 0x130   :  { %647 = vmatmul.f32.gmra.mxu0 %v1733_v45  ;;  %694 = vmatmul.f32.gmra.mxu1 %v1736_v27  ;;  %v311_v32 = vmul.f32 %v1752_v8, %v1718_v9  ;;  %vm308_vm2 = vmor %vm306_vm0, %vm307_vm1  ;;  %vm317_vm4 = vweird.f32 %v1752_v8  ;;  %v467_v55 = vld [vmem:[#allocation8 + $0x168] sm:$0xff] }
 0x131   :  { %741 = vmatmul.f32.gmra.mxu2 %v1733_v45  ;;  %788 = vmatmul.f32.gmra.mxu3 %v1736_v27  ;;  %v289_v60 = vsel %vm288_vm12, %v1295_v43, %v285_v51  ;;  %v302_v11 = vmul.f32 %v1297_v52, %v301_v61  ;;  %v295_v43 = vmul.f32 %v1689_v62, %v294_v59  ;;  %v508_v51 = vld [vmem:[#allocation8 + $0x2b0] sm:$0xff]  ;;  %vm318_vm5 = vmor %vm316_vm3, %vm317_vm4 }
 0x132   :  { %v356_v42 = vmul.f32 %v289_v60, %v1591_v6  ;;  %v357_v22 = vmul.f32 %v289_v60, %v1594_v7  ;;  %v1773_v6 = vpop.eup %1300  ;;  %v312_v14 = vmul.f32 %v1752_v8, %v311_v32  ;;  %910 = vmatpush.msrb.mxu2 %v515_v28  ;;  %958 = vmatpush.msrb.mxu3 %v605_v44  ;;  %v592_v32 = vld [vmem:[#allocation8 + $0x550] sm:$0xff] }
 0x133   :  { %v303_v0 = vmul.f32 0.5, %v302_v11  ;;  %v299_v1 = vsel %vm298_vm15, %v1689_v62, %v295_v43  ;;  %v321_v34 = vmul.f32 %v1773_v6, %v1745_v38  ;;  %817 = vmatpush.msrb.mxu0 %v508_v51  ;;  %v593_v43 = vld [vmem:[#allocation8 + $0x558] sm:$0xff]  ;;  %865 = vmatpush.msrb.mxu1 %v598_v54  ;;  %vm327_vm7 = vweird.f32 %v1773_v6  ;;  %v563_v54 = vld [vmem:[#allocation8 + $0x468] sm:$0xff] }
 0x134   :  { %v382_v13 = vmul.f32 %v1676_v49, %v356_v42  ;;  %v383_v7 = vmul.f32 %v1678_v50, %v357_v22  ;;  %v358_v29 = vmul.f32 %v299_v1, %v1560_v47  ;;  %v359_v20 = vmul.f32 %v299_v1, %v1562_v48  ;;  %911 = vmatpush.msrb.mxu2 %v509_v63  ;;  %v497_v42 = vld [vmem:[#allocation8 + $0x258] sm:$0xff]  ;;  %v491_v22 = vld [vmem:[#allocation8 + $0x228] sm:$0xff]  ;;  %vm328_vm8 = vmor %vm326_vm6, %vm327_vm7 }
 0x135   :  { %v304_v23 = vsub.f32 1.5, %v303_v0  ;;  %v313_v12 = vmul.f32 0.5, %v312_v14  ;;  %v322_v39 = vmul.f32 %v1773_v6, %v321_v34  ;;  %959 = vmatpush.msrb.mxu3 %v599_v41  ;;  %v496_v0 = vld [vmem:[#allocation8 + $0x250] sm:$0xff]  ;;  %v485_v14 = vld [vmem:[#allocation8 + $0x1f8] sm:$0xff]  ;;  %866 = vmatpush.msrb.mxu1 %v592_v32  ;;  %v574_v41 = vld [vmem:[#allocation8 + $0x4c0] sm:$0xff] }
 0x136   :  { %v1783_v35 = vadd.f32 %v1681_v56, %v382_v13  ;;  %v1787_v62 = vadd.f32 %v1683_v57, %v383_v7  ;;  %v384_v47 = vmul.f32 %v1676_v49, %v358_v29  ;;  %v385_v48 = vmul.f32 %v1678_v50, %v359_v20  ;;  %912 = vmatpush.msrb.mxu2 %v503_v46  ;;  %v587_v13 = vld [vmem:[#allocation8 + $0x528] sm:$0xff]  ;;  %v490_v29 = vld [vmem:[#allocation8 + $0x220] sm:$0xff]  ;;  %v581_v34 = vld [vmem:[#allocation8 + $0x4f8] sm:$0xff] }
 0x137   :  { %v305_v10 = vmul.f32 %v1297_v52, %v304_v23  ;;  %v314_v2 = vsub.f32 1.5, %v313_v12  ;;  %v323_v60 = vmul.f32 0.5, %v322_v39  ;;  %960 = vmatpush.msrb.mxu3 %v593_v43  ;;  %v586_v23 = vld [vmem:[#allocation8 + $0x520] sm:$0xff]  ;;  %v479_v20 = vld [vmem:[#allocation8 + $0x1c8] sm:$0xff]  ;;  %v580_v63 = vld [vmem:[#allocation8 + $0x4f0] sm:$0xff] }
 0x138   :  { %650 = vmatmul.f32.gmra.mxu0 %v1758_v15  ;;  %697 = vmatmul.f32.gmra.mxu1 %v1761_v16  ;;  %v1799_v58 = vadd.f32 %v1681_v56, %v384_v47  ;;  %v1803_v59 = vadd.f32 %v1683_v57, %v385_v48  ;;  %v473_v48 = vld [vmem:[#allocation8 + $0x198] sm:$0xff]  ;;  %v478_v46 = vld [vmem:[#allocation8 + $0x1c0] sm:$0xff] }
 0x139   :  { %744 = vmatmul.f32.gmra.mxu2 %v1758_v15  ;;  %791 = vmatmul.f32.gmra.mxu3 %v1761_v16  ;;  %v309_v3 = vsel %vm308_vm2, %v1297_v52, %v305_v10  ;;  %v315_v61 = vmul.f32 %v1752_v8, %v314_v2  ;;  %v324_v9 = vsub.f32 1.5, %v323_v60  ;;  %v569_v51 = vld [vmem:[#allocation8 + $0x498] sm:$0xff]  ;;  %v568_v60 = vld [vmem:[#allocation8 + $0x490] sm:$0xff]  ;;  %v562_v32 = vld [vmem:[#allocation8 + $0x460] sm:$0xff] }
 0x13a   :  { %v360_v52 = vmul.f32 %v309_v3, %v1628_v19  ;;  %v361_v11 = vmul.f32 %v309_v3, %v1631_v33  ;;  %v502_v19 = vld [vmem:[#allocation8 + $0x280] sm:$0xff]  ;;  %913 = vmatpush.msrb.mxu2 %v497_v42  ;;  %961 = vmatpush.msrb.mxu3 %v587_v13  ;;  %v557_v13 = vld [vmem:[#allocation8 + $0x438] sm:$0xff] }
 0x13b   :  { %v319_v1 = vsel %vm318_vm5, %v1752_v8, %v315_v61  ;;  %818 = vmatpush.msrb.mxu0 %v502_v19  ;;  %867 = vmatpush.msrb.mxu1 %v586_v23  ;;  %v325_v10 = vmul.f32 %v1773_v6, %v324_v9  ;;  %v460_v9 = vld [vmem:[#allocation8 + $0x130] sm:$0xff]  ;;  %v455_v23 = vld [vmem:[#allocation8 + $0x108] sm:$0xff] }
 0x13c   :  { %v386_v33 = vmul.f32 %v1676_v49, %v360_v52  ;;  %v387_v7 = vmul.f32 %v1678_v50, %v361_v11  ;;  %914 = vmatpush.msrb.mxu2 %v491_v22  ;;  %v362_v12 = vmul.f32 %v319_v1, %v1622_v31  ;;  %v363_v47 = vmul.f32 %v319_v1, %v1625_v18  ;;  %v575_v31 = vld [vmem:[#allocation8 + $0x4c8] sm:$0xff]  ;;  %v472_v52 = vld [vmem:[#allocation8 + $0x190] sm:$0xff]  ;;  %v466_v22 = vld [vmem:[#allocation8 + $0x160] sm:$0xff] }
 0x13d   :  { %819 = vmatpush.msrb.mxu0 %v496_v0  ;;  %962 = vmatpush.msrb.mxu3 %v581_v34  ;;  %v329_v39 = vsel %vm328_vm8, %v1773_v6, %v325_v10  ;;  %v461_v0 = vld [vmem:[#allocation8 + $0x138] sm:$0xff]  ;;  %v556_v1 = vld [vmem:[#allocation8 + $0x430] sm:$0xff]  ;;  %v454_v34 = vld [vmem:[#allocation8 + $0x100] sm:$0xff] }
 0x13e   :  { %v1822_v8 = vadd.f32 %v1681_v56, %v386_v33  ;;  %915 = vmatpush.msrb.mxu2 %v485_v14  ;;  %v1827_v28 = vadd.f32 %v1683_v57, %v387_v7  ;;  %v388_v18 = vmul.f32 %v1676_v49, %v362_v12  ;;  %v389_v38 = vmul.f32 %v1678_v50, %v363_v47  ;;  %v1863_v7 = vld [vmem:[#allocation10] sm:$0x3f]  ;;  %v449_v10 = vld [vmem:[#allocation8 + $0xd8] sm:$0xff] }
 0x13f   :  { %820 = vmatpush.msrb.mxu0 %v490_v29  ;;  %963 = vmatpush.msrb.mxu3 %v575_v31  ;;  %v364_v2 = vmul.f32 %v329_v39, %v1608_v24  ;;  %v365_v26 = vmul.f32 %v329_v39, %v1611_v25  ;;  %v551_v29 = vld [vmem:[#allocation8 + $0x408] sm:$0xff]  ;;  %v1866_v47 = vperm.slane %v1863_v7, 0 }
 0x140   :  { %653 = vmatmul.f32.gmra.mxu0 %v1783_v35  ;;  %700 = vmatmul.f32.gmra.mxu1 %v1787_v62  ;;  %v1840_v3 = vadd.f32 %v1681_v56, %v388_v18  ;;  %v1844_v44 = vadd.f32 %v1683_v57, %v389_v38  ;;  %v443_v31 = vld [vmem:[#allocation8 + $0xa8] sm:$0xff]  ;;  %v544_v18 = vld [vmem:[#allocation8 + $0x3d0] sm:$0xff]  ;;  %v437_v38 = vld [vmem:[#allocation8 + $0x78] sm:$0xff] }
 0x141   :  { %747 = vmatmul.f32.gmra.mxu2 %v1783_v35  ;;  %794 = vmatmul.f32.gmra.mxu3 %v1787_v62  ;;  %v390_v6 = vmul.f32 %v1676_v49, %v364_v2  ;;  %v391_v24 = vmul.f32 %v1678_v50, %v365_v26  ;;  %v442_v2 = vld [vmem:[#allocation8 + $0xa0] sm:$0xff]  ;;  %v533_v26 = vld [vmem:[#allocation8 + $0x378] sm:$0xff] }
 0x142   :  { %916 = vmatpush.msrb.mxu2 %v479_v20  ;;  %821 = vmatpush.msrb.mxu0 %v484_v36  ;;  %v550_v20 = vld [vmem:[#allocation8 + $0x400] sm:$0xff]  ;;  %v545_v36 = vld [vmem:[#allocation8 + $0x3d8] sm:$0xff] }
 0x143   :  { %868 = vmatpush.msrb.mxu1 %v580_v63  ;;  %v1853_v40 = vadd.f32 %v1681_v56, %v390_v6  ;;  %v1856_v25 = vadd.f32 %v1683_v57, %v391_v24  ;;  %964 = vmatpush.msrb.mxu3 %v569_v51  ;;  %v448_v63 = vld [vmem:[#allocation8 + $0xd0] sm:$0xff] }
 0x144   :  { %917 = vmatpush.msrb.mxu2 %v473_v48  ;;  %822 = vmatpush.msrb.mxu0 %v478_v46  ;;  %v539_v48 = vld [vmem:[#allocation8 + $0x3a8] sm:$0xff]  ;;  %v538_v46 = vld [vmem:[#allocation8 + $0x3a0] sm:$0xff]  ;;  %v436_v51 = vld [vmem:[#allocation8 + $0x70] sm:$0xff] }
 0x145   :  { %869 = vmatpush.msrb.mxu1 %v574_v41  ;;  %965 = vmatpush.msrb.mxu3 %v563_v54  ;;  %v527_v54 = vld [vmem:[#allocation8 + $0x348] sm:$0xff] }
 0x146   :  { %918 = vmatpush.msrb.mxu2 %v467_v55  ;;  %823 = vmatpush.msrb.mxu0 %v472_v52  ;;  %v431_v52 = vld [vmem:[#allocation8 + $0x48] sm:$0xff] }
 0x147   :  { %870 = vmatpush.msrb.mxu1 %v568_v60  ;;  %966 = vmatpush.msrb.mxu3 %v557_v13  ;;  %v532_v60 = vld [vmem:[#allocation8 + $0x370] sm:$0xff] }
 0x148   :  { %656 = vmatmul.f32.gmra.mxu0 %v1799_v58  ;;  %703 = vmatmul.f32.gmra.mxu1 %v1803_v59 }
 0x149   :  { %750 = vmatmul.f32.gmra.mxu2 %v1799_v58  ;;  %797 = vmatmul.f32.gmra.mxu3 %v1803_v59 }
 0x14a   :  { %824 = vmatpush.msrb.mxu0 %v466_v22  ;;  %871 = vmatpush.msrb.mxu1 %v562_v32  ;;  %v526_v22 = vld [vmem:[#allocation8 + $0x340] sm:$0xff] }
 0x14b   :  { %919 = vmatpush.msrb.mxu2 %v461_v0  ;;  %967 = vmatpush.msrb.mxu3 %v551_v29  ;;  %v521_v0 = vld [vmem:[#allocation8 + $0x318] sm:$0xff] }
 0x14c   :  { %825 = vmatpush.msrb.mxu0 %v460_v9  ;;  %872 = vmatpush.msrb.mxu1 %v556_v1  ;;  %v520_v1 = vld [vmem:[#allocation8 + $0x310] sm:$0xff] }
 0x14d   :  { %920 = vmatpush.msrb.mxu2 %v455_v23  ;;  %968 = vmatpush.msrb.mxu3 %v545_v36  ;;  %v613_v36 = vld [vmem:[#allocation8 + $0x5f8] sm:$0xff] }
 0x14e   :  { %826 = vmatpush.msrb.mxu0 %v454_v34  ;;  %873 = vmatpush.msrb.mxu1 %v550_v20 }
 0x14f   :  { %921 = vmatpush.msrb.mxu2 %v449_v10  ;;  %969 = vmatpush.msrb.mxu3 %v539_v48  ;;  %v517_v10 = vld [vmem:[#allocation8 + $0x2f8] sm:$0xff]  ;;  %v511_v48 = vld [vmem:[#allocation8 + $0x2c8] sm:$0xff] }
 0x150   :  { %659 = vmatmul.f32.gmra.mxu0 %v1822_v8  ;;  %706 = vmatmul.f32.gmra.mxu1 %v1827_v28 }
 0x151   :  { %753 = vmatmul.f32.gmra.mxu2 %v1822_v8  ;;  %800 = vmatmul.f32.gmra.mxu3 %v1827_v28 }
 0x152   :  { %827 = vmatpush.msrb.mxu0 %v448_v63  ;;  %874 = vmatpush.msrb.mxu1 %v544_v18  ;;  %v516_v18 = vld [vmem:[#allocation8 + $0x2f0] sm:$0xff] }
 0x153   :  { %922 = vmatpush.msrb.mxu2 %v443_v31  ;;  %970 = vmatpush.msrb.mxu3 %v533_v26 }
 0x154   :  { %828 = vmatpush.msrb.mxu0 %v442_v2  ;;  %875 = vmatpush.msrb.mxu1 %v538_v46 }
 0x155   :  { %923 = vmatpush.msrb.mxu2 %v437_v38  ;;  %971 = vmatpush.msrb.mxu3 %v527_v54  ;;  %v505_v54 = vld [vmem:[#allocation8 + $0x298] sm:$0xff] }
 0x156   :  { %829 = vmatpush.msrb.mxu0 %v436_v51  ;;  %876 = vmatpush.msrb.mxu1 %v532_v60  ;;  %v510_v60 = vld [vmem:[#allocation8 + $0x2c0] sm:$0xff] }
 0x157   :  { %924 = vmatpush.msrb.mxu2 %v431_v52  ;;  %972 = vmatpush.msrb.mxu3 %v521_v0  ;;  %v612_v52 = vld [vmem:[#allocation8 + $0x5f0] sm:$0xff] }
 0x158   :  { %662 = vmatmul.f32.gmra.mxu0 %v1840_v3  ;;  %709 = vmatmul.f32.gmra.mxu1 %v1844_v44 }
 0x159   :  { %756 = vmatmul.f32.gmra.mxu2 %v1840_v3  ;;  %803 = vmatmul.f32.gmra.mxu3 %v1844_v44 }
 0x15a   :  { %877 = vmatpush.msrb.mxu1 %v526_v22  ;;  %1145 = vmatpush.msra.mxu3 %v613_v36  ;;  %v499_v22 = vld [vmem:[#allocation8 + $0x268] sm:$0xff] }
 0x15c   :  { %878 = vmatpush.msrb.mxu1 %v520_v1 }
 0x15e   :  { %1051 = vmatpush.msra.mxu1 %v612_v52 }
 0x160   :  { %665 = vmatmul.f32.gmra.mxu0 %v1853_v40  ;;  %712 = vmatmul.f32.gmra.mxu1 %v1856_v25 }
 0x161   :  { %759 = vmatmul.f32.gmra.mxu2 %v1853_v40  ;;  %806 = vmatmul.f32.gmra.mxu3 %v1856_v25 }
 0x18f   :  { %v226_v61 = vpop.xlane.xlu0 %225 }
 0x190   :  { %v238_v11 = vmul.f32 %v226_v61, %v1547_v30 }
 0x192   :  { %v248_v42 = vadd.f32 1e-05, %v238_v11 }
 0x194   :  { %1302 = vrsqrt.f32 %v248_v42  ;;  %vm336_vm10 = vweird.f32 %v248_v42 }
 0x19a   :  { %v1303_v19 = vpop.eup %1302 }
 0x19b   :  { %v331_v43 = vmul.f32 %v1303_v19, %v248_v42  ;;  %vm337_vm9 = vweird.f32 %v1303_v19 }
 0x19c   :  { %vm338_vm11 = vmor %vm336_vm10, %vm337_vm9 }
 0x19d   :  { %v332_v33 = vmul.f32 %v1303_v19, %v331_v43  ;;  %v430_v43 = vld [vmem:[#allocation8 + $0x40] sm:$0xff] }
 0x19e   :  { %830 = vmatpush.msrb.mxu0 %v430_v43  ;;  %v606_v43 = vld [vmem:[#allocation8 + $0x5c0] sm:$0xff] }
 0x19f   :  { %v333_v14 = vmul.f32 0.5, %v332_v33  ;;  %1052 = vmatpush.msra.mxu1 %v606_v43 }
 0x1a1   :  { %v334_v12 = vsub.f32 1.5, %v333_v14  ;;  %v229_v42 = vpop.xlane.xlu1 %228 }
 0x1a2   :  { %v239_v32 = vmul.f32 %v229_v42, %v1547_v30  ;;  %v601_v42 = vld [vmem:[#allocation8 + $0x598] sm:$0xff] }
 0x1a3   :  { %v335_v39 = vmul.f32 %v1303_v19, %v334_v12 }
 0x1a4   :  { %v1878_v14 = vadd.f32 1e-05, %v239_v32 }
 0x1a5   :  { %v645_v6 = vpop.f32.mrf.mxu0  ;;  %v692_v24 = vpop.f32.mrf.mxu1  ;;  %v339_v41 = vsel %vm338_vm11, %v1303_v19, %v335_v39  ;;  %v425_v19 = vld [vmem:[#allocation8 + $0x18] sm:$0xff]  ;;  %v607_v39 = vld [vmem:[#allocation8 + $0x5c8] sm:$0xff] }
 0x1a6   :  { %v646_v55 = vadd.f32 %v645_v6, %v1866_v47  ;;  %v366_v61 = vmul.f32 %v339_v41, %v1653_v4  ;;  %v367_v11 = vmul.f32 %v339_v41, %v1656_v5  ;;  %v1876_v4 = vperm.slane %v1863_v7, 1  ;;  %v424_v5 = vld [vmem:[#allocation8 + $0x10] sm:$0xff]  ;;  %925 = vmatpush.msrb.mxu2 %v425_v19  ;;  %1146 = vmatpush.msra.mxu3 %v607_v39  ;;  %v589_v39 = vld [vmem:[#allocation8 + $0x538] sm:$0xff] }
 0x1a7   :  { %1304 = vrsqrt.f32 %v1878_v14  ;;  %831 = vmatpush.msrb.mxu0 %v424_v5  ;;  %vm346_vm13 = vweird.f32 %v1878_v14 }
 0x1a8   :  { %v693_v33 = vadd.f32 %v692_v24, %v646_v55  ;;  %v392_v13 = vmul.f32 %v1676_v49, %v366_v61  ;;  %v393_v9 = vmul.f32 %v1678_v50, %v367_v11  ;;  %1098 = vmatpush.msra.mxu2 %v517_v10  ;;  %1147 = vmatpush.msra.mxu3 %v601_v42  ;;  %v600_v10 = vld [vmem:[#allocation8 + $0x590] sm:$0xff] }
 0x1a9   :  { %1004 = vmatpush.msra.mxu0 %v516_v18  ;;  %v498_v18 = vld [vmem:[#allocation8 + $0x260] sm:$0xff]  ;;  %1053 = vmatpush.msra.mxu1 %v600_v10 }
 0x1aa   :  { %1192 = vst [vmem:[#allocation11] sm:$0xff] %v693_v33  ;;  %v1881_v30 = vadd.f32 %v1681_v56, %v392_v13  ;;  %v1884_v23 = vadd.f32 %v1683_v57, %v393_v9  ;;  %1099 = vmatpush.msra.mxu2 %v511_v48 }
 0x1ab   :  { %1005 = vmatpush.msra.mxu0 %v510_v60  ;;  %v481_v60 = vld [vmem:[#allocation8 + $0x1d8] sm:$0xff] }
 0x1ac   :  { %v739_v29 = vpop.f32.mrf.mxu2  ;;  %v786_v20 = vpop.f32.mrf.mxu3  ;;  %668 = vmatmul.f32.gmra.mxu0 %v1881_v30  ;;  %715 = vmatmul.f32.gmra.mxu1 %v1884_v23 }
 0x1ad   :  { %v740_v34 = vadd.f32 %v739_v29, %v1876_v4  ;;  %v648_v12 = vpop.f32.mrf.mxu0  ;;  %762 = vmatmul.f32.gmra.mxu2 %v1881_v30  ;;  %809 = vmatmul.f32.gmra.mxu3 %v1884_v23  ;;  %v695_v63 = vpop.f32.mrf.mxu1 }
 0x1ae   :  { %v649_v31 = vadd.f32 %v648_v12, %v1866_v47  ;;  %v1305_v26 = vpop.eup %1304  ;;  %1100 = vmatpush.msra.mxu2 %v505_v54  ;;  %v595_v12 = vld [vmem:[#allocation8 + $0x568] sm:$0xff]  ;;  %v588_v54 = vld [vmem:[#allocation8 + $0x530] sm:$0xff] }
 0x1af   :  { %v787_v38 = vadd.f32 %v786_v20, %v740_v34  ;;  %v341_v6 = vmul.f32 %v1305_v26, %v1878_v14  ;;  %vm347_vm12 = vweird.f32 %v1305_v26  ;;  %v504_v20 = vld [vmem:[#allocation8 + $0x290] sm:$0xff]  ;;  %1148 = vmatpush.msra.mxu3 %v595_v12  ;;  %v493_v14 = vld [vmem:[#allocation8 + $0x238] sm:$0xff] }
 0x1b0   :  { %v696_v2 = vadd.f32 %v695_v63, %v649_v31  ;;  %1101 = vmatpush.msra.mxu2 %v499_v22  ;;  %vm348_vm14 = vmor %vm346_vm13, %vm347_vm12  ;;  %1006 = vmatpush.msra.mxu0 %v504_v20 }
 0x1b1   :  { %1193 = vst [vmem:[#allocation11 + $0x8] sm:$0xff] %v787_v38  ;;  %v342_v46 = vmul.f32 %v1305_v26, %v341_v6  ;;  %1149 = vmatpush.msra.mxu3 %v589_v39 }
 0x1b2   :  { %1198 = vst [vmem:[#allocation11 + $0x30] sm:$0xff] %v696_v2  ;;  %1102 = vmatpush.msra.mxu2 %v493_v14  ;;  %v594_v2 = vld [vmem:[#allocation8 + $0x560] sm:$0xff]  ;;  %1007 = vmatpush.msra.mxu0 %v498_v18  ;;  %v565_v18 = vld [vmem:[#allocation8 + $0x478] sm:$0xff] }
 0x1b3   :  { %v343_v32 = vmul.f32 0.5, %v342_v46  ;;  %1054 = vmatpush.msra.mxu1 %v594_v2  ;;  %v474_v14 = vld [vmem:[#allocation8 + $0x1a0] sm:$0xff] }
 0x1b4   :  { %v742_v24 = vpop.f32.mrf.mxu2  ;;  %v789_v41 = vpop.f32.mrf.mxu3  ;;  %v570_v2 = vld [vmem:[#allocation8 + $0x4a0] sm:$0xff] }
 0x1b5   :  { %v743_v51 = vadd.f32 %v742_v24, %v1876_v4  ;;  %v651_v55 = vpop.f32.mrf.mxu0  ;;  %v698_v11 = vpop.f32.mrf.mxu1  ;;  %v344_v0 = vsub.f32 1.5, %v343_v32  ;;  %1055 = vmatpush.msra.mxu1 %v588_v54 }
 0x1b6   :  { %v652_v61 = vadd.f32 %v651_v55, %v1866_v47  ;;  %v583_v55 = vld [vmem:[#allocation8 + $0x508] sm:$0xff] }
 0x1b7   :  { %v790_v33 = vadd.f32 %v789_v41, %v743_v51  ;;  %v345_v13 = vmul.f32 %v1305_v26, %v344_v0  ;;  %v487_v41 = vld [vmem:[#allocation8 + $0x208] sm:$0xff]  ;;  %1150 = vmatpush.msra.mxu3 %v583_v55  ;;  %v582_v0 = vld [vmem:[#allocation8 + $0x500] sm:$0xff]  ;;  %v564_v55 = vld [vmem:[#allocation8 + $0x470] sm:$0xff] }
 0x1b8   :  { %v699_v19 = vadd.f32 %v698_v11, %v652_v61  ;;  %1103 = vmatpush.msra.mxu2 %v487_v41  ;;  %v486_v61 = vld [vmem:[#allocation8 + $0x200] sm:$0xff]  ;;  %1056 = vmatpush.msra.mxu1 %v582_v0  ;;  %v547_v0 = vld [vmem:[#allocation8 + $0x3e8] sm:$0xff] }
 0x1b9   :  { %1199 = vst [vmem:[#allocation11 + $0x38] sm:$0xff] %v790_v33  ;;  %v349_v5 = vsel %vm348_vm14, %v1305_v26, %v345_v13  ;;  %v475_v13 = vld [vmem:[#allocation8 + $0x1a8] sm:$0xff] }
 0x1ba   :  { %1204 = vst [vmem:[#allocation11 + $0x60] sm:$0xff] %v699_v19  ;;  %v368_v36 = vmul.f32 %v349_v5, %v1716_v21  ;;  %v369_v31 = vmul.f32 %v349_v5, %v1724_v37  ;;  %1104 = vmatpush.msra.mxu2 %v481_v60  ;;  %v577_v19 = vld [vmem:[#allocation8 + $0x4d8] sm:$0xff] }
 0x1bb   :  { %1151 = vmatpush.msra.mxu3 %v577_v19  ;;  %v553_v60 = vld [vmem:[#allocation8 + $0x418] sm:$0xff]  ;;  %v456_v19 = vld [vmem:[#allocation8 + $0x110] sm:$0xff] }
 0x1bc   :  { %v745_v9 = vpop.f32.mrf.mxu2  ;;  %v792_v29 = vpop.f32.mrf.mxu3  ;;  %v394_v26 = vmul.f32 %v1676_v49, %v368_v36  ;;  %v395_v6 = vmul.f32 %v1678_v50, %v369_v31  ;;  %1105 = vmatpush.msra.mxu2 %v475_v13  ;;  %v552_v13 = vld [vmem:[#allocation8 + $0x410] sm:$0xff] }
 0x1bd   :  { %v746_v1 = vadd.f32 %v745_v9, %v1876_v4  ;;  %v654_v34 = vpop.f32.mrf.mxu0  ;;  %v701_v48 = vpop.f32.mrf.mxu1 }
 0x1be   :  { %v655_v63 = vadd.f32 %v654_v34, %v1866_v47  ;;  %v1904_v21 = vadd.f32 %v1681_v56, %v394_v26  ;;  %v1907_v37 = vadd.f32 %v1683_v57, %v395_v6  ;;  %v492_v56 = vld [vmem:[#allocation8 + $0x230] sm:$0xff]  ;;  %v463_v26 = vld [vmem:[#allocation8 + $0x148] sm:$0xff] }
 0x1bf   :  { %v793_v38 = vadd.f32 %v792_v29, %v746_v1  ;;  %1008 = vmatpush.msra.mxu0 %v492_v56  ;;  %v480_v1 = vld [vmem:[#allocation8 + $0x1d0] sm:$0xff]  ;;  %v571_v29 = vld [vmem:[#allocation8 + $0x4a8] sm:$0xff] }
 0x1c0   :  { %v702_v24 = vadd.f32 %v701_v48, %v655_v63  ;;  %671 = vmatmul.f32.gmra.mxu0 %v1904_v21  ;;  %718 = vmatmul.f32.gmra.mxu1 %v1907_v37  ;;  %v576_v34 = vld [vmem:[#allocation8 + $0x4d0] sm:$0xff]  ;;  %v469_v48 = vld [vmem:[#allocation8 + $0x178] sm:$0xff] }
 0x1c1   :  { %1205 = vst [vmem:[#allocation11 + $0x68] sm:$0xff] %v793_v38  ;;  %765 = vmatmul.f32.gmra.mxu2 %v1904_v21  ;;  %812 = vmatmul.f32.gmra.mxu3 %v1907_v37  ;;  %v468_v6 = vld [vmem:[#allocation8 + $0x170] sm:$0xff] }
 0x1c2   :  { %1210 = vst [vmem:[#allocation11 + $0x90] sm:$0xff] %v702_v24  ;;  %1009 = vmatpush.msra.mxu0 %v486_v61  ;;  %1152 = vmatpush.msra.mxu3 %v571_v29  ;;  %v558_v61 = vld [vmem:[#allocation8 + $0x440] sm:$0xff]  ;;  %v541_v29 = vld [vmem:[#allocation8 + $0x3b8] sm:$0xff] }
 0x1c3   :  { %1057 = vmatpush.msra.mxu1 %v576_v34  ;;  %1106 = vmatpush.msra.mxu2 %v469_v48  ;;  %v438_v48 = vld [vmem:[#allocation8 + $0x80] sm:$0xff] }
 0x1c4   :  { %v748_v46 = vpop.f32.mrf.mxu2  ;;  %v795_v50 = vpop.f32.mrf.mxu3  ;;  %1010 = vmatpush.msra.mxu0 %v480_v1  ;;  %1153 = vmatpush.msra.mxu3 %v565_v18  ;;  %v450_v1 = vld [vmem:[#allocation8 + $0xe0] sm:$0xff] }
 0x1c5   :  { %v749_v49 = vadd.f32 %v748_v46, %v1876_v4  ;;  %v657_v51 = vpop.f32.mrf.mxu0  ;;  %v704_v52 = vpop.f32.mrf.mxu1  ;;  %1058 = vmatpush.msra.mxu1 %v570_v2  ;;  %v559_v46 = vld [vmem:[#allocation8 + $0x448] sm:$0xff]  ;;  %1107 = vmatpush.msra.mxu2 %v463_v26  ;;  %v534_v18 = vld [vmem:[#allocation8 + $0x380] sm:$0xff]  ;;  %v528_v2 = vld [vmem:[#allocation8 + $0x350] sm:$0xff] }
 0x1c6   :  { %v658_v57 = vadd.f32 %v657_v51, %v1866_v47  ;;  %1011 = vmatpush.msra.mxu0 %v474_v14  ;;  %1154 = vmatpush.msra.mxu3 %v559_v46  ;;  %v529_v14 = vld [vmem:[#allocation8 + $0x358] sm:$0xff]  ;;  %v523_v26 = vld [vmem:[#allocation8 + $0x328] sm:$0xff] }
 0x1c7   :  { %v796_v11 = vadd.f32 %v795_v50, %v749_v49  ;;  %1059 = vmatpush.msra.mxu1 %v564_v55 }
 0x1c8   :  { %v705_v42 = vadd.f32 %v704_v52, %v658_v57  ;;  %832 = vmatmul.f32.vlgmr.msrb.gmra.mxu0 %v1696_v53  ;;  %879 = vmatmul.f32.vlgmr.msrb.gmra.mxu1 %v1699_v17  ;;  %v457_v57 = vld [vmem:[#allocation8 + $0x118] sm:$0xff]  ;;  %v462_v52 = vld [vmem:[#allocation8 + $0x140] sm:$0xff] }
 0x1c9   :  { %1211 = vst [vmem:[#allocation11 + $0x98] sm:$0xff] %v796_v11  ;;  %926 = vmatmul.f32.vlgmr.msrb.gmra.mxu2 %v1696_v53  ;;  %973 = vmatmul.f32.vlgmr.msrb.gmra.mxu3 %v1699_v17  ;;  %v451_v11 = vld [vmem:[#allocation8 + $0xe8] sm:$0xff] }
 0x1ca   :  { %1216 = vst [vmem:[#allocation11 + $0xc0] sm:$0xff] %v705_v42  ;;  %1012 = vmatpush.msra.mxu0 %v468_v6  ;;  %1108 = vmatpush.msra.mxu2 %v457_v57  ;;  %v426_v6 = vld [vmem:[#allocation8 + $0x20] sm:$0xff] }
 0x1cb   :  { %1155 = vmatpush.msra.mxu3 %v553_v60  ;;  %1060 = vmatpush.msra.mxu1 %v558_v61 }
 0x1cc   :  { %v751_v43 = vpop.f32.mrf.mxu2  ;;  %v798_v32 = vpop.f32.mrf.mxu3  ;;  %1013 = vmatpush.msra.mxu0 %v462_v52  ;;  %1109 = vmatpush.msra.mxu2 %v451_v11 }
 0x1cd   :  { %v752_v22 = vadd.f32 %v751_v43, %v1876_v4  ;;  %v660_v33 = vpop.f32.mrf.mxu0  ;;  %v707_v5 = vpop.f32.mrf.mxu1  ;;  %1156 = vmatpush.msra.mxu3 %v547_v0  ;;  %1061 = vmatpush.msra.mxu1 %v552_v13 }
 0x1ce   :  { %v661_v9 = vadd.f32 %v660_v33, %v1866_v47  ;;  %1014 = vmatpush.msra.mxu0 %v456_v19 }
 0x1cf   :  { %v799_v20 = vadd.f32 %v798_v32, %v752_v22  ;;  %1157 = vmatpush.msra.mxu3 %v541_v29 }
 0x1d0   :  { %v708_v12 = vadd.f32 %v707_v5, %v661_v9  ;;  %835 = vmatmul.f32.gmra.mxu0 %v1733_v45  ;;  %882 = vmatmul.f32.gmra.mxu1 %v1736_v27  ;;  %v445_v5 = vld [vmem:[#allocation8 + $0xb8] sm:$0xff] }
 0x1d1   :  { %1217 = vst [vmem:[#allocation11 + $0xc8] sm:$0xff] %v799_v20  ;;  %929 = vmatmul.f32.gmra.mxu2 %v1733_v45  ;;  %976 = vmatmul.f32.gmra.mxu3 %v1736_v27  ;;  %v546_v20 = vld [vmem:[#allocation8 + $0x3e0] sm:$0xff] }
 0x1d2   :  { %1222 = vst [vmem:[#allocation11 + $0xf0] sm:$0xff] %v708_v12  ;;  %1110 = vmatpush.msra.mxu2 %v445_v5  ;;  %1015 = vmatpush.msra.mxu0 %v450_v1  ;;  %v439_v12 = vld [vmem:[#allocation8 + $0x88] sm:$0xff] }
 0x1d3   :  { %1062 = vmatpush.msra.mxu1 %v546_v20 }
 0x1d4   :  { %v754_v10 = vpop.f32.mrf.mxu2  ;;  %v801_v31 = vpop.f32.mrf.mxu3  ;;  %1111 = vmatpush.msra.mxu2 %v439_v12 }
 0x1d5   :  { %v755_v36 = vadd.f32 %v754_v10, %v1876_v4  ;;  %v663_v63 = vpop.f32.mrf.mxu0  ;;  %v710_v38 = vpop.f32.mrf.mxu1  ;;  %v444_v10 = vld [vmem:[#allocation8 + $0xb0] sm:$0xff] }
 0x1d6   :  { %v664_v39 = vadd.f32 %v663_v63, %v1866_v47  ;;  %1016 = vmatpush.msra.mxu0 %v444_v10  ;;  %v433_v63 = vld [vmem:[#allocation8 + $0x58] sm:$0xff] }
 0x1d7   :  { %v802_v24 = vadd.f32 %v801_v31, %v755_v36  ;;  %v535_v36 = vld [vmem:[#allocation8 + $0x388] sm:$0xff]  ;;  %v540_v31 = vld [vmem:[#allocation8 + $0x3b0] sm:$0xff]  ;;  %1112 = vmatpush.msra.mxu2 %v433_v63 }
 0x1d8   :  { %v711_v49 = vadd.f32 %v710_v38, %v664_v39  ;;  %838 = vmatmul.f32.gmra.mxu0 %v1758_v15  ;;  %885 = vmatmul.f32.gmra.mxu1 %v1761_v16  ;;  %v427_v39 = vld [vmem:[#allocation8 + $0x28] sm:$0xff]  ;;  %v432_v38 = vld [vmem:[#allocation8 + $0x50] sm:$0xff] }
 0x1d9   :  { %1223 = vst [vmem:[#allocation11 + $0xf8] sm:$0xff] %v802_v24  ;;  %932 = vmatmul.f32.gmra.mxu2 %v1758_v15  ;;  %979 = vmatmul.f32.gmra.mxu3 %v1761_v16  ;;  %v522_v24 = vld [vmem:[#allocation8 + $0x320] sm:$0xff] }
 0x1da   :  { %1228 = vst [vmem:[#allocation11 + $0x120] sm:$0xff] %v711_v49  ;;  %1158 = vmatpush.msra.mxu3 %v535_v36  ;;  %1063 = vmatpush.msra.mxu1 %v540_v31 }
 0x1db   :  { %1017 = vmatpush.msra.mxu0 %v438_v48  ;;  %1113 = vmatpush.msra.mxu2 %v427_v39 }
 0x1dc   :  { %v757_v50 = vpop.f32.mrf.mxu2  ;;  %v804_v41 = vpop.f32.mrf.mxu3  ;;  %1159 = vmatpush.msra.mxu3 %v529_v14  ;;  %1064 = vmatpush.msra.mxu1 %v534_v18 }
 0x1dd   :  { %v758_v51 = vadd.f32 %v757_v50, %v1876_v4  ;;  %v666_v56 = vpop.f32.mrf.mxu0  ;;  %v713_v43 = vpop.f32.mrf.mxu1  ;;  %1018 = vmatpush.msra.mxu0 %v432_v38 }
 0x1de   :  { %v667_v54 = vadd.f32 %v666_v56, %v1866_v47  ;;  %1065 = vmatpush.msra.mxu1 %v528_v2  ;;  %1160 = vmatpush.msra.mxu3 %v523_v26 }
 0x1df   :  { %v805_v42 = vadd.f32 %v804_v41, %v758_v51  ;;  %1019 = vmatpush.msra.mxu0 %v426_v6 }
 0x1e0   :  { %v714_v22 = vadd.f32 %v713_v43, %v667_v54  ;;  %841 = vmatmul.f32.gmra.mxu0 %v1783_v35  ;;  %888 = vmatmul.f32.gmra.mxu1 %v1787_v62 }
 0x1e1   :  { %1229 = vst [vmem:[#allocation11 + $0x128] sm:$0xff] %v805_v42  ;;  %935 = vmatmul.f32.gmra.mxu2 %v1783_v35  ;;  %982 = vmatmul.f32.gmra.mxu3 %v1787_v62 }
 0x1e2   :  { %1234 = vst [vmem:[#allocation11 + $0x150] sm:$0xff] %v714_v22  ;;  %1066 = vmatpush.msra.mxu1 %v522_v24 }
 0x1e4   :  { %v760_v32 = vpop.f32.mrf.mxu2  ;;  %v807_v9 = vpop.f32.mrf.mxu3 }
 0x1e5   :  { %v761_v33 = vadd.f32 %v760_v32, %v1876_v4 }
 0x1e7   :  { %v808_v34 = vadd.f32 %v807_v9, %v761_v33 }
 0x1e8   :  { %844 = vmatmul.f32.gmra.mxu0 %v1799_v58  ;;  %891 = vmatmul.f32.gmra.mxu1 %v1803_v59 }
 0x1e9   :  { %1235 = vst [vmem:[#allocation11 + $0x158] sm:$0xff] %v808_v34  ;;  %938 = vmatmul.f32.gmra.mxu2 %v1799_v58  ;;  %985 = vmatmul.f32.gmra.mxu3 %v1803_v59 }
 0x1f0   :  { %847 = vmatmul.f32.gmra.mxu0 %v1822_v8  ;;  %894 = vmatmul.f32.gmra.mxu1 %v1827_v28 }
 0x1f1   :  { %941 = vmatmul.f32.gmra.mxu2 %v1822_v8  ;;  %988 = vmatmul.f32.gmra.mxu3 %v1827_v28 }
 0x1f8   :  { %850 = vmatmul.f32.gmra.mxu0 %v1840_v3  ;;  %897 = vmatmul.f32.gmra.mxu1 %v1844_v44 }
 0x1f9   :  { %944 = vmatmul.f32.gmra.mxu2 %v1840_v3  ;;  %991 = vmatmul.f32.gmra.mxu3 %v1844_v44 }
 0x200   :  { %853 = vmatmul.f32.gmra.mxu0 %v1853_v40  ;;  %900 = vmatmul.f32.gmra.mxu1 %v1856_v25 }
 0x201   :  { %947 = vmatmul.f32.gmra.mxu2 %v1853_v40  ;;  %994 = vmatmul.f32.gmra.mxu3 %v1856_v25 }
 0x208   :  { %856 = vmatmul.f32.gmra.mxu0 %v1881_v30  ;;  %903 = vmatmul.f32.gmra.mxu1 %v1884_v23 }
 0x209   :  { %950 = vmatmul.f32.gmra.mxu2 %v1881_v30  ;;  %997 = vmatmul.f32.gmra.mxu3 %v1884_v23 }
 0x210   :  { %859 = vmatmul.f32.gmra.mxu0 %v1904_v21  ;;  %906 = vmatmul.f32.gmra.mxu1 %v1907_v37 }
 0x211   :  { %953 = vmatmul.f32.gmra.mxu2 %v1904_v21  ;;  %1000 = vmatmul.f32.gmra.mxu3 %v1907_v37 }
 0x218   :  { %1020 = vmatmul.f32.vlgmr.msra.gmra.mxu0 %v1696_v53  ;;  %1067 = vmatmul.f32.vlgmr.msra.gmra.mxu1 %v1699_v17 }
 0x219   :  { %1114 = vmatmul.f32.vlgmr.msra.gmra.mxu2 %v1696_v53  ;;  %1161 = vmatmul.f32.vlgmr.msra.gmra.mxu3 %v1699_v17 }
 0x220   :  { %1023 = vmatmul.f32.gmra.mxu0 %v1733_v45  ;;  %1070 = vmatmul.f32.gmra.mxu1 %v1736_v27 }
 0x221   :  { %1117 = vmatmul.f32.gmra.mxu2 %v1733_v45  ;;  %1164 = vmatmul.f32.gmra.mxu3 %v1736_v27 }
 0x228   :  { %1026 = vmatmul.f32.gmra.mxu0 %v1758_v15  ;;  %1073 = vmatmul.f32.gmra.mxu1 %v1761_v16 }
 0x229   :  { %v669_v46 = vpop.f32.mrf.mxu0  ;;  %v716_v50 = vpop.f32.mrf.mxu1  ;;  %1120 = vmatmul.f32.gmra.mxu2 %v1758_v15  ;;  %1167 = vmatmul.f32.gmra.mxu3 %v1761_v16 }
 0x22a   :  { %v670_v49 = vadd.f32 %v669_v46, %v1866_v47 }
 0x22c   :  { %v717_v53 = vadd.f32 %v716_v50, %v670_v49 }
 0x22e   :  { %1240 = vst [vmem:[#allocation11 + $0x180] sm:$0xff] %v717_v53 }
 0x230   :  { %v763_v17 = vpop.f32.mrf.mxu2  ;;  %v810_v45 = vpop.f32.mrf.mxu3  ;;  %1029 = vmatmul.f32.gmra.mxu0 %v1783_v35  ;;  %1076 = vmatmul.f32.gmra.mxu1 %v1787_v62 }
 0x231   :  { %v764_v51 = vadd.f32 %v763_v17, %v1876_v4  ;;  %1123 = vmatmul.f32.gmra.mxu2 %v1783_v35  ;;  %1170 = vmatmul.f32.gmra.mxu3 %v1787_v62  ;;  %v1990_v35 = vperm.slane %v1863_v7, 2 }
 0x233   :  { %v811_v27 = vadd.f32 %v810_v45, %v764_v51 }
 0x235   :  { %1241 = vst [vmem:[#allocation11 + $0x188] sm:$0xff] %v811_v27 }
 0x238   :  { %1032 = vmatmul.f32.gmra.mxu0 %v1799_v58  ;;  %1079 = vmatmul.f32.gmra.mxu1 %v1803_v59 }
 0x239   :  { %1126 = vmatmul.f32.gmra.mxu2 %v1799_v58  ;;  %1173 = vmatmul.f32.gmra.mxu3 %v1803_v59 }
 0x23d   :  { %v672_v15 = vpop.f32.mrf.mxu0  ;;  %v719_v16 = vpop.f32.mrf.mxu1 }
 0x23e   :  { %v673_v41 = vadd.f32 %v672_v15, %v1866_v47 }
 0x240   :  { %v720_v56 = vadd.f32 %v719_v16, %v673_v41  ;;  %1035 = vmatmul.f32.gmra.mxu0 %v1822_v8  ;;  %1082 = vmatmul.f32.gmra.mxu1 %v1827_v28 }
 0x241   :  { %1129 = vmatmul.f32.gmra.mxu2 %v1822_v8  ;;  %1176 = vmatmul.f32.gmra.mxu3 %v1827_v28  ;;  %v1999_v8 = vperm.slane %v1863_v7, 3 }
 0x242   :  { %1246 = vst [vmem:[#allocation11 + $0x1b0] sm:$0xff] %v720_v56 }
 0x244   :  { %v766_v62 = vpop.f32.mrf.mxu2  ;;  %v813_v58 = vpop.f32.mrf.mxu3 }
 0x245   :  { %v767_v59 = vadd.f32 %v766_v62, %v1876_v4  ;;  %v833_v55 = vpop.f32.mrf.mxu0  ;;  %v880_v57 = vpop.f32.mrf.mxu1 }
 0x246   :  { %v834_v47 = vadd.f32 %v833_v55, %v1990_v35 }
 0x247   :  { %v814_v52 = vadd.f32 %v813_v58, %v767_v59 }
 0x248   :  { %v881_v54 = vadd.f32 %v880_v57, %v834_v47  ;;  %1038 = vmatmul.f32.gmra.mxu0 %v1840_v3  ;;  %1085 = vmatmul.f32.gmra.mxu1 %v1844_v44 }
 0x249   :  { %1247 = vst [vmem:[#allocation11 + $0x1b8] sm:$0xff] %v814_v52  ;;  %1132 = vmatmul.f32.gmra.mxu2 %v1840_v3  ;;  %1179 = vmatmul.f32.gmra.mxu3 %v1844_v44 }
 0x24a   :  { %1194 = vst [vmem:[#allocation11 + $0x10] sm:$0xff] %v881_v54 }
 0x24c   :  { %v927_v28 = vpop.f32.mrf.mxu2  ;;  %v974_v4 = vpop.f32.mrf.mxu3 }
 0x24d   :  { %v928_v60 = vadd.f32 %v927_v28, %v1999_v8  ;;  %v836_v61 = vpop.f32.mrf.mxu0  ;;  %v883_v11 = vpop.f32.mrf.mxu1 }
 0x24e   :  { %v837_v42 = vadd.f32 %v836_v61, %v1990_v35 }
 0x24f   :  { %v975_v43 = vadd.f32 %v974_v4, %v928_v60 }
 0x250   :  { %v884_v22 = vadd.f32 %v883_v11, %v837_v42  ;;  %1041 = vmatmul.f32.gmra.mxu0 %v1853_v40  ;;  %1088 = vmatmul.f32.gmra.mxu1 %v1856_v25 }
 0x251   :  { %1195 = vst [vmem:[#allocation11 + $0x18] sm:$0xff] %v975_v43  ;;  %1135 = vmatmul.f32.gmra.mxu2 %v1853_v40  ;;  %1182 = vmatmul.f32.gmra.mxu3 %v1856_v25 }
 0x252   :  { %1200 = vst [vmem:[#allocation11 + $0x40] sm:$0xff] %v884_v22 }
 0x254   :  { %v930_v3 = vpop.f32.mrf.mxu2  ;;  %v977_v44 = vpop.f32.mrf.mxu3 }
 0x255   :  { %v931_v32 = vadd.f32 %v930_v3, %v1999_v8  ;;  %v839_v33 = vpop.f32.mrf.mxu0  ;;  %v886_v19 = vpop.f32.mrf.mxu1 }
 0x256   :  { %v840_v0 = vadd.f32 %v839_v33, %v1990_v35  ;;  %v2032_v33 = vperm.slane %v1863_v7, 4 }
 0x257   :  { %v978_v13 = vadd.f32 %v977_v44, %v931_v32 }
 0x258   :  { %v887_v9 = vadd.f32 %v886_v19, %v840_v0  ;;  %1044 = vmatmul.f32.gmra.mxu0 %v1881_v30  ;;  %1091 = vmatmul.f32.gmra.mxu1 %v1884_v23 }
 0x259   :  { %1201 = vst [vmem:[#allocation11 + $0x48] sm:$0xff] %v978_v13  ;;  %1138 = vmatmul.f32.gmra.mxu2 %v1881_v30  ;;  %1185 = vmatmul.f32.gmra.mxu3 %v1884_v23 }
 0x25a   :  { %1206 = vst [vmem:[#allocation11 + $0x70] sm:$0xff] %v887_v9 }
 0x25c   :  { %v933_v40 = vpop.f32.mrf.mxu2  ;;  %v980_v25 = vpop.f32.mrf.mxu3 }
 0x25d   :  { %v934_v5 = vadd.f32 %v933_v40, %v1999_v8  ;;  %v842_v1 = vpop.f32.mrf.mxu0  ;;  %v889_v29 = vpop.f32.mrf.mxu1 }
 0x25e   :  { %v843_v34 = vadd.f32 %v842_v1, %v1990_v35 }
 0x25f   :  { %v981_v20 = vadd.f32 %v980_v25, %v934_v5 }
 0x260   :  { %v890_v12 = vadd.f32 %v889_v29, %v843_v34  ;;  %1047 = vmatmul.f32.gmra.mxu0 %v1904_v21  ;;  %1094 = vmatmul.f32.gmra.mxu1 %v1907_v37 }
 0x261   :  { %1207 = vst [vmem:[#allocation11 + $0x78] sm:$0xff] %v981_v20  ;;  %1141 = vmatmul.f32.gmra.mxu2 %v1904_v21  ;;  %1188 = vmatmul.f32.gmra.mxu3 %v1907_v37 }
 0x262   :  { %1212 = vst [vmem:[#allocation11 + $0xa0] sm:$0xff] %v890_v12 }
 0x264   :  { %v936_v30 = vpop.f32.mrf.mxu2  ;;  %v983_v23 = vpop.f32.mrf.mxu3 }
 0x265   :  { %v937_v10 = vadd.f32 %v936_v30, %v1999_v8  ;;  %v845_v36 = vpop.f32.mrf.mxu0  ;;  %v892_v31 = vpop.f32.mrf.mxu1 }
 0x266   :  { %v846_v63 = vadd.f32 %v845_v36, %v1990_v35 }
 0x267   :  { %v984_v48 = vadd.f32 %v983_v23, %v937_v10 }
 0x268   :  { %v893_v14 = vadd.f32 %v892_v31, %v846_v63 }
 0x269   :  { %1213 = vst [vmem:[#allocation11 + $0xa8] sm:$0xff] %v984_v48 }
 0x26a   :  { %1218 = vst [vmem:[#allocation11 + $0xd0] sm:$0xff] %v893_v14 }
 0x26c   :  { %v939_v18 = vpop.f32.mrf.mxu2  ;;  %v986_v39 = vpop.f32.mrf.mxu3 }
 0x26d   :  { %v940_v38 = vadd.f32 %v939_v18, %v1999_v8  ;;  %v848_v21 = vpop.f32.mrf.mxu0  ;;  %v895_v2 = vpop.f32.mrf.mxu1 }
 0x26e   :  { %v849_v37 = vadd.f32 %v848_v21, %v1990_v35 }
 0x26f   :  { %v987_v26 = vadd.f32 %v986_v39, %v940_v38 }
 0x270   :  { %v896_v6 = vadd.f32 %v895_v2, %v849_v37 }
 0x271   :  { %1219 = vst [vmem:[#allocation11 + $0xd8] sm:$0xff] %v987_v26 }
 0x272   :  { %1224 = vst [vmem:[#allocation11 + $0x100] sm:$0xff] %v896_v6 }
 0x274   :  { %v942_v24 = vpop.f32.mrf.mxu2  ;;  %v989_v46 = vpop.f32.mrf.mxu3 }
 0x275   :  { %v943_v49 = vadd.f32 %v942_v24, %v1999_v8  ;;  %v851_v50 = vpop.f32.mrf.mxu0  ;;  %v898_v53 = vpop.f32.mrf.mxu1 }
 0x276   :  { %v852_v17 = vadd.f32 %v851_v50, %v1990_v35 }
 0x277   :  { %v990_v51 = vadd.f32 %v989_v46, %v943_v49 }
 0x278   :  { %v899_v45 = vadd.f32 %v898_v53, %v852_v17 }
 0x279   :  { %1225 = vst [vmem:[#allocation11 + $0x108] sm:$0xff] %v990_v51 }
 0x27a   :  { %1230 = vst [vmem:[#allocation11 + $0x130] sm:$0xff] %v899_v45 }
 0x27c   :  { %v945_v27 = vpop.f32.mrf.mxu2  ;;  %v992_v15 = vpop.f32.mrf.mxu3 }
 0x27d   :  { %v946_v16 = vadd.f32 %v945_v27, %v1999_v8  ;;  %v854_v41 = vpop.f32.mrf.mxu0  ;;  %v901_v56 = vpop.f32.mrf.mxu1 }
 0x27e   :  { %v855_v62 = vadd.f32 %v854_v41, %v1990_v35 }
 0x27f   :  { %v993_v58 = vadd.f32 %v992_v15, %v946_v16 }
 0x280   :  { %v902_v59 = vadd.f32 %v901_v56, %v855_v62 }
 0x281   :  { %1231 = vst [vmem:[#allocation11 + $0x138] sm:$0xff] %v993_v58 }
 0x282   :  { %1236 = vst [vmem:[#allocation11 + $0x160] sm:$0xff] %v902_v59 }
 0x284   :  { %v948_v55 = vpop.f32.mrf.mxu2  ;;  %v995_v57 = vpop.f32.mrf.mxu3 }
 0x285   :  { %v949_v47 = vadd.f32 %v948_v55, %v1999_v8  ;;  %v857_v52 = vpop.f32.mrf.mxu0  ;;  %v904_v54 = vpop.f32.mrf.mxu1 }
 0x286   :  { %v858_v28 = vadd.f32 %v857_v52, %v1990_v35 }
 0x287   :  { %v996_v4 = vadd.f32 %v995_v57, %v949_v47 }
 0x288   :  { %v905_v60 = vadd.f32 %v904_v54, %v858_v28 }
 0x289   :  { %1237 = vst [vmem:[#allocation11 + $0x168] sm:$0xff] %v996_v4 }
 0x28a   :  { %1242 = vst [vmem:[#allocation11 + $0x190] sm:$0xff] %v905_v60 }
 0x28c   :  { %v951_v61 = vpop.f32.mrf.mxu2  ;;  %v998_v11 = vpop.f32.mrf.mxu3 }
 0x28d   :  { %v952_v42 = vadd.f32 %v951_v61, %v1999_v8  ;;  %v860_v43 = vpop.f32.mrf.mxu0  ;;  %v907_v22 = vpop.f32.mrf.mxu1 }
 0x28e   :  { %v861_v3 = vadd.f32 %v860_v43, %v1990_v35  ;;  %v2037_v35 = vperm.slane %v1863_v7, 5 }
 0x28f   :  { %v999_v44 = vadd.f32 %v998_v11, %v952_v42 }
 0x290   :  { %v908_v32 = vadd.f32 %v907_v22, %v861_v3 }
 0x291   :  { %1243 = vst [vmem:[#allocation11 + $0x198] sm:$0xff] %v999_v44 }
 0x292   :  { %1248 = vst [vmem:[#allocation11 + $0x1c0] sm:$0xff] %v908_v32 }
 0x294   :  { %v954_v19 = vpop.f32.mrf.mxu2  ;;  %v1001_v0 = vpop.f32.mrf.mxu3 }
 0x295   :  { %v955_v13 = vadd.f32 %v954_v19, %v1999_v8  ;;  %v1021_v9 = vpop.f32.mrf.mxu0  ;;  %v1068_v40 = vpop.f32.mrf.mxu1 }
 0x296   :  { %v1022_v25 = vadd.f32 %v1021_v9, %v2032_v33 }
 0x297   :  { %v1002_v5 = vadd.f32 %v1001_v0, %v955_v13 }
 0x298   :  { %v1069_v1 = vadd.f32 %v1068_v40, %v1022_v25 }
 0x299   :  { %1249 = vst [vmem:[#allocation11 + $0x1c8] sm:$0xff] %v1002_v5 }
 0x29a   :  { %1196 = vst [vmem:[#allocation11 + $0x20] sm:$0xff] %v1069_v1 }
 0x29c   :  { %v1115_v29 = vpop.f32.mrf.mxu2  ;;  %v1162_v34 = vpop.f32.mrf.mxu3 }
 0x29d   :  { %v1116_v20 = vadd.f32 %v1115_v29, %v2037_v35  ;;  %v1024_v12 = vpop.f32.mrf.mxu0  ;;  %v1071_v30 = vpop.f32.mrf.mxu1 }
 0x29e   :  { %v1025_v23 = vadd.f32 %v1024_v12, %v2032_v33 }
 0x29f   :  { %v1163_v8 = vadd.f32 %v1162_v34, %v1116_v20 }
 0x2a0   :  { %v1072_v10 = vadd.f32 %v1071_v30, %v1025_v23 }
 0x2a1   :  { %1197 = vst [vmem:[#allocation11 + $0x28] sm:$0xff] %v1163_v8 }
 0x2a2   :  { %1202 = vst [vmem:[#allocation11 + $0x50] sm:$0xff] %v1072_v10 }
 0x2a4   :  { %v1118_v36 = vpop.f32.mrf.mxu2  ;;  %v1165_v31 = vpop.f32.mrf.mxu3 }
 0x2a5   :  { %v1119_v63 = vadd.f32 %v1118_v36, %v2037_v35  ;;  %v1027_v48 = vpop.f32.mrf.mxu0  ;;  %v1074_v7 = vpop.f32.mrf.mxu1 }
 0x2a6   :  { %v1028_v14 = vadd.f32 %v1027_v48, %v2032_v33 }
 0x2a7   :  { %v1166_v18 = vadd.f32 %v1165_v31, %v1119_v63 }
 0x2a8   :  { %v1075_v39 = vadd.f32 %v1074_v7, %v1028_v14 }
 0x2a9   :  { %1203 = vst [vmem:[#allocation11 + $0x58] sm:$0xff] %v1166_v18 }
 0x2aa   :  { %1208 = vst [vmem:[#allocation11 + $0x80] sm:$0xff] %v1075_v39 }
 0x2ac   :  { %v1121_v38 = vpop.f32.mrf.mxu2  ;;  %v1168_v21 = vpop.f32.mrf.mxu3 }
 0x2ad   :  { %v1122_v2 = vadd.f32 %v1121_v38, %v2037_v35  ;;  %v1030_v37 = vpop.f32.mrf.mxu0  ;;  %v1077_v26 = vpop.f32.mrf.mxu1 }
 0x2ae   :  { %v1031_v6 = vadd.f32 %v1030_v37, %v2032_v33 }
 0x2af   :  { %v1169_v24 = vadd.f32 %v1168_v21, %v1122_v2 }
 0x2b0   :  { %v1078_v46 = vadd.f32 %v1077_v26, %v1031_v6 }
 0x2b1   :  { %1209 = vst [vmem:[#allocation11 + $0x88] sm:$0xff] %v1169_v24 }
 0x2b2   :  { %1214 = vst [vmem:[#allocation11 + $0xb0] sm:$0xff] %v1078_v46 }
 0x2b4   :  { %v1124_v49 = vpop.f32.mrf.mxu2  ;;  %v1171_v50 = vpop.f32.mrf.mxu3 }
 0x2b5   :  { %v1125_v53 = vadd.f32 %v1124_v49, %v2037_v35  ;;  %v1033_v17 = vpop.f32.mrf.mxu0  ;;  %v1080_v51 = vpop.f32.mrf.mxu1 }
 0x2b6   :  { %v1034_v45 = vadd.f32 %v1033_v17, %v2032_v33 }
 0x2b7   :  { %v1172_v27 = vadd.f32 %v1171_v50, %v1125_v53 }
 0x2b8   :  { %v1081_v15 = vadd.f32 %v1080_v51, %v1034_v45 }
 0x2b9   :  { %1215 = vst [vmem:[#allocation11 + $0xb8] sm:$0xff] %v1172_v27 }
 0x2ba   :  { %1220 = vst [vmem:[#allocation11 + $0xe0] sm:$0xff] %v1081_v15 }
 0x2bc   :  { %v1127_v16 = vpop.f32.mrf.mxu2  ;;  %v1174_v41 = vpop.f32.mrf.mxu3 }
 0x2bd   :  { %v1128_v56 = vadd.f32 %v1127_v16, %v2037_v35  ;;  %v1036_v62 = vpop.f32.mrf.mxu0  ;;  %v1083_v58 = vpop.f32.mrf.mxu1 }
 0x2be   :  { %v1037_v59 = vadd.f32 %v1036_v62, %v2032_v33 }
 0x2bf   :  { %v1175_v55 = vadd.f32 %v1174_v41, %v1128_v56 }
 0x2c0   :  { %v1084_v57 = vadd.f32 %v1083_v58, %v1037_v59 }
 0x2c1   :  { %1221 = vst [vmem:[#allocation11 + $0xe8] sm:$0xff] %v1175_v55 }
 0x2c2   :  { %1226 = vst [vmem:[#allocation11 + $0x110] sm:$0xff] %v1084_v57 }
 0x2c4   :  { %v1130_v47 = vpop.f32.mrf.mxu2  ;;  %v1177_v52 = vpop.f32.mrf.mxu3 }
 0x2c5   :  { %v1131_v54 = vadd.f32 %v1130_v47, %v2037_v35  ;;  %v1039_v28 = vpop.f32.mrf.mxu0  ;;  %v1086_v4 = vpop.f32.mrf.mxu1 }
 0x2c6   :  { %v1040_v60 = vadd.f32 %v1039_v28, %v2032_v33 }
 0x2c7   :  { %v1178_v61 = vadd.f32 %v1177_v52, %v1131_v54 }
 0x2c8   :  { %v1087_v11 = vadd.f32 %v1086_v4, %v1040_v60 }
 0x2c9   :  { %1227 = vst [vmem:[#allocation11 + $0x118] sm:$0xff] %v1178_v61 }
 0x2ca   :  { %1232 = vst [vmem:[#allocation11 + $0x140] sm:$0xff] %v1087_v11 }
 0x2cc   :  { %v1133_v42 = vpop.f32.mrf.mxu2  ;;  %v1180_v43 = vpop.f32.mrf.mxu3 }
 0x2cd   :  { %v1134_v22 = vadd.f32 %v1133_v42, %v2037_v35  ;;  %v1042_v3 = vpop.f32.mrf.mxu0  ;;  %v1089_v44 = vpop.f32.mrf.mxu1 }
 0x2ce   :  { %v1043_v32 = vadd.f32 %v1042_v3, %v2032_v33 }
 0x2cf   :  { %v1181_v19 = vadd.f32 %v1180_v43, %v1134_v22 }
 0x2d0   :  { %v1090_v0 = vadd.f32 %v1089_v44, %v1043_v32 }
 0x2d1   :  { %1233 = vst [vmem:[#allocation11 + $0x148] sm:$0xff] %v1181_v19 }
 0x2d2   :  { %1238 = vst [vmem:[#allocation11 + $0x170] sm:$0xff] %v1090_v0 }
 0x2d4   :  { %v1136_v13 = vpop.f32.mrf.mxu2  ;;  %v1183_v9 = vpop.f32.mrf.mxu3 }
 0x2d5   :  { %v1137_v40 = vadd.f32 %v1136_v13, %v2037_v35  ;;  %v1045_v25 = vpop.f32.mrf.mxu0  ;;  %v1092_v5 = vpop.f32.mrf.mxu1 }
 0x2d6   :  { %v1046_v1 = vadd.f32 %v1045_v25, %v2032_v33 }
 0x2d7   :  { %v1184_v29 = vadd.f32 %v1183_v9, %v1137_v40 }
 0x2d8   :  { %v1093_v34 = vadd.f32 %v1092_v5, %v1046_v1 }
 0x2d9   :  { %1239 = vst [vmem:[#allocation11 + $0x178] sm:$0xff] %v1184_v29 }
 0x2da   :  { %1244 = vst [vmem:[#allocation11 + $0x1a0] sm:$0xff] %v1093_v34 }
 0x2dc   :  { %v1139_v20 = vpop.f32.mrf.mxu2  ;;  %v1186_v12 = vpop.f32.mrf.mxu3 }
 0x2dd   :  { %v1140_v30 = vadd.f32 %v1139_v20, %v2037_v35  ;;  %v1048_v23 = vpop.f32.mrf.mxu0  ;;  %v1095_v36 = vpop.f32.mrf.mxu1 }
 0x2de   :  { %v1049_v8 = vadd.f32 %v1048_v23, %v2032_v33 }
 0x2df   :  { %v1187_v10 = vadd.f32 %v1186_v12, %v1140_v30 }
 0x2e0   :  { %v1096_v31 = vadd.f32 %v1095_v36, %v1049_v8 }
 0x2e1   :  { %1245 = vst [vmem:[#allocation11 + $0x1a8] sm:$0xff] %v1187_v10 }
 0x2e2   :  { %1250 = vst [vmem:[#allocation11 + $0x1d0] sm:$0xff] %v1096_v31 }
 0x2e4   :  { %v1142_v63 = vpop.f32.mrf.mxu2  ;;  %v1189_v7 = vpop.f32.mrf.mxu3 }
 0x2e5   :  { %v1143_v48 = vadd.f32 %v1142_v63, %v2037_v35 }
 0x2e7   :  { %v1190_v14 = vadd.f32 %v1189_v7, %v1143_v48 }
 0x2e9   :  { %1251 = vst [vmem:[#allocation11 + $0x1d8] sm:$0xff] %v1190_v14 }
 0x2ea   :  { %1264 = dma.vmem_to_hbm [thread:$0]  %s1257_s4, 7680, %s1259_s21, [#allocation4], %s1460_s28, %s1460_s28, %s1461_s29  }
 0x2eb   :  { %1456 = dma.done.wait [#allocation4], 7680  }
 0x2ec   :  { %1457 = vsyncadd [#allocation4], 4294959616 }
 0x2ed   :  { %1269 = vsyncpa [#allocation3], 1 }
 0x2ee   :  { %1270 = vsyncpa [#allocation6], 1 }
 0x2ef   :  { %1271 = vsyncpa [#allocation9], 1 }
 0x2f0   :  { %1272 = vsyncpa [#allocation4], 1 }

</bundles_post_ra>
